<compile_context>
chip_gen: v5e
topology: v5e:2x2
jax: 0.10.0
libtpu: 0.0.40
codegen_flags: <defaults>
</compile_context>

<pallas_src>
import numpy as np
import jax
import jax.numpy as jnp
from jax.experimental import pallas as pl
from jax.experimental.pallas import tpu as pltpu


# ----------------------------- fused kernel ---------------------------------

def _lenet5_kernel(x_ref, w1_ref, ph1_ref, w2_ref, ph2_ref, fcw_ref, b_ref,
                   o_ref):
    """TB images per grid step; all intermediates stay in VMEM.

    Layouts (TB = images per step):
      x_ref   : [TB, 3, 32, 32]   raw NCHW block (no wrapper transpose pass)
      w1_ref  : [3, 32, 640]      per-in-channel conv1 Toeplitz slabs with the
                                  2x2 width-average folded in; the 5 kernel
                                  rows are concatenated along lanes (84->128
                                  zero-padded each)
      ph1_ref : [5, TB*14, TB*32] block-diag height shift + 2x pool (conv1),
                                  output rows b-major
      w2_ref  : [128, 640]        conv2 Toeplitz slab (K 84->128, rows i
                                  concatenated along lanes, 80->128 padded)
      ph2_ref : [5, 5*TB, TB*14]  block-diag height shift + 2x pool (conv2),
                                  output rows h-major -> [h*TB+b]
      fcw_ref : [7, 128, 128]     fc1 (h=0..4, rows permuted to (w,c)), fc2,
                                  fc3, all zero-padded to 128x128
      b_ref   : [8, 128]          pooled conv1/conv2 bias, fc1/fc2/fc3 bias
      o_ref   : [TB, 128]         lane-dense logits (cols 10..127 are zero)
    """
    f32 = jnp.float32
    cdt = w1_ref.dtype                       # MXU operand dtype (bfloat16)
    tb = x_ref.shape[0]

    bias = b_ref[...]                        # [8, 128] f32
    x = x_ref[...]                           # [TB, 3, 32, 32] f32

    # ---- conv1 (5x5, 3->6, valid) + 2x2 avg-pool ---------------------------
    def chan(c):                             # [TB*32, 32], rows = (b, h)
        return x[:, c, :, :].reshape(tb * 32, 32).astype(cdt)

    t1 = jnp.dot(chan(0), w1_ref[0], preferred_element_type=f32)
    for c in (1, 2):
        t1 = t1 + jnp.dot(chan(c), w1_ref[c], preferred_element_type=f32)
    t1 = t1.astype(cdt)                      # [TB*32, 640]

    y1 = jnp.dot(ph1_ref[0], t1[:, 0:128], preferred_element_type=f32)
    for i in range(1, 5):
        y1 = y1 + jnp.dot(ph1_ref[i], t1[:, 128 * i:128 * (i + 1)],
                          preferred_element_type=f32)
    y1 = (y1 + bias[0:1, :]).astype(cdt)     # [TB*14, 128], rows = (b, h)

    # ---- conv2 (5x5, 6->16, valid) + 2x2 avg-pool --------------------------
    t2 = jnp.dot(y1, w2_ref[...], preferred_element_type=f32).astype(cdt)
    y2 = jnp.dot(ph2_ref[0], t2[:, 0:128], preferred_element_type=f32)
    for i in range(1, 5):
        y2 = y2 + jnp.dot(ph2_ref[i], t2[:, 128 * i:128 * (i + 1)],
                          preferred_element_type=f32)
    y2 = (y2 + bias[1:2, :]).astype(cdt)     # [5*TB, 128], rows = (h, b)

    # ---- fc1 -> ReLU -> fc2 -> ReLU -> fc3, batched over the TB images -----
    z = jnp.dot(y2[0:tb, :], fcw_ref[0], preferred_element_type=f32)
    for h in range(1, 5):
        z = z + jnp.dot(y2[h * tb:(h + 1) * tb, :], fcw_ref[h],
                        preferred_element_type=f32)
    z = jnp.maximum(z + bias[2:3, :], 0.0).astype(cdt)            # [TB, 128]
    z = jnp.maximum(jnp.dot(z, fcw_ref[5], preferred_element_type=f32)
                    + bias[3:4, :], 0.0).astype(cdt)              # [TB, 128]
    out = jnp.dot(z, fcw_ref[6], preferred_element_type=f32) + bias[4:5, :]
    o_ref[...] = out.astype(o_ref.dtype)                          # [TB, 128]


# ------------------------ weight packing (prep, outside kernel) -------------

def _width_shift_pool(kw, out_w, in_w):
    """s[p, q, j] = 0.5 for p in {2q+j, 2q+j+1}: conv col j + 2x width avg."""
    s = np.zeros((in_w, out_w, kw), np.float32)
    for q in range(out_w):
        for j in range(kw):
            s[2 * q + j, q, j] = 0.5
            s[2 * q + j + 1, q, j] = 0.5
    return s


def _hpool1_blockdiag(tb):
    """[5, tb*14, tb*32]: per-kernel-row height shift + 2x pool, b-major out."""
    m = np.zeros((5, tb, 14, tb, 32), np.float32)
    for i in range(5):
        for b in range(tb):
            for o in range(14):
                m[i, b, o, b, 2 * o + i] = 0.5
                m[i, b, o, b, 2 * o + i + 1] = 0.5
    return m.reshape(5, tb * 14, tb * 32)


def _hpool2_blockdiag(tb):
    """[5, 5*tb, tb*14]: conv2 height shift + 2x pool, h-major output rows."""
    m = np.zeros((5, 5, tb, tb, 14), np.float32)
    for i in range(5):
        for o in range(5):
            for b in range(tb):
                m[i, o, b, b, 2 * o + i] = 0.5
                m[i, o, b, b, 2 * o + i + 1] = 0.5
    return m.reshape(5, 5 * tb, tb * 14)


def _pack_weights(params, tb, dtype=jnp.bfloat16):
    """Precompute the VMEM-resident operands consumed by the fused kernel."""
    w1, b1 = params["conv1_w"], params["conv1_b"]        # [6,3,5,5], [6]
    w2, b2 = params["conv2_w"], params["conv2_b"]        # [16,6,5,5], [16]

    s1 = jnp.asarray(_width_shift_pool(5, 14, 32))       # [32, 14, 5]
    s2 = jnp.asarray(_width_shift_pool(5, 5, 14))        # [14,  5, 5]

    # conv1: per input channel, kernel rows concatenated along lanes.
    w1p = jnp.einsum("pqj,ocij->cipqo", s1, w1).reshape(3, 5, 32, 14 * 6)
    w1p = jnp.pad(w1p, ((0, 0), (0, 0), (0, 0), (0, 128 - 84)))
    w1p = jnp.transpose(w1p, (0, 2, 1, 3)).reshape(3, 32, 5 * 128)

    # conv2: K = (w, c) lane layout of y1 (84 -> 128 padded), rows i along N.
    w2p = jnp.einsum("pqj,ocij->ipcqo", s2, w2).reshape(5, 14 * 6, 5 * 16)
    w2p = jnp.pad(w2p, ((0, 0), (0, 128 - 84), (0, 128 - 80)))
    w2p = jnp.transpose(w2p, (1, 0, 2)).reshape(128, 5 * 128)

    ph1 = jnp.asarray(_hpool1_blockdiag(tb))             # [5, tb*14, tb*32]
    ph2 = jnp.asarray(_hpool2_blockdiag(tb))             # [5, 5*tb, tb*14]

    # fc1 rows permuted from PyTorch's (c, h, w) flatten to (h, (w, c)) blocks.
    fc1p = params["fc1_w"].reshape(16, 5, 5, 120).transpose(1, 2, 0, 3)
    fc1p = fc1p.reshape(5, 80, 120)
    fc1p = jnp.pad(fc1p, ((0, 0), (0, 48), (0, 8)))               # [5,128,128]
    fc2p = jnp.pad(params["fc2_w"], ((0, 8), (0, 44)))[None]      # [1,128,128]
    fc3p = jnp.pad(params["fc3_w"], ((0, 44), (0, 118)))[None]    # [1,128,128]
    fcw = jnp.concatenate([fc1p, fc2p, fc3p], axis=0)             # [7,128,128]

    # Biases (avg-pool of a constant bias is the bias, tiled over width).
    bias = jnp.zeros((8, 128), jnp.float32)
    bias = bias.at[0, :84].set(jnp.tile(b1, 14))
    bias = bias.at[1, :80].set(jnp.tile(b2, 5))
    bias = bias.at[2, :120].set(params["fc1_b"])
    bias = bias.at[3, :84].set(params["fc2_b"])
    bias = bias.at[4, :10].set(params["fc3_b"])

    cast = lambda a: a.astype(dtype)
    return (cast(w1p), cast(ph1), cast(w2p), cast(ph2), cast(fcw), bias)


# ------------------------------- forward -------------------------------------

def lenet5_forward(params, x_nchw, *, tb=8, mxu_dtype=jnp.bfloat16):
    """x_nchw: [B, 3, 32, 32] float32 -> logits [B, 10]."""
    B = x_nchw.shape[0]
    assert x_nchw.shape[1:] == (3, 32, 32), x_nchw.shape
    x = x_nchw.astype(jnp.float32)

    # Images per grid step.  If there is more than one step, TB must be a
    # multiple of 8 so the lane-dense (TB, 128) output block stays aligned.
    if B <= tb:
        TB = B
    else:
        TB = max(8, (tb // 8) * 8)
    steps = pl.cdiv(B, TB)
    Bp = steps * TB
    if Bp != B:
        x = jnp.pad(x, ((0, Bp - B), (0, 0), (0, 0), (0, 0)))

    weights = _pack_weights(params, TB, mxu_dtype)

    in_specs = [pl.BlockSpec((TB, 3, 32, 32), lambda s: (s, 0, 0, 0))]
    in_specs += [pl.BlockSpec(w.shape, lambda s, _n=w.ndim: (0,) * _n)
                 for w in weights]
    out_specs = pl.BlockSpec((TB, 128), lambda s: (s, 0))

    per_step_flops = 2 * (
        3 * (TB * 32) * 32 * 640            # conv1 slab matmuls
        + 5 * (TB * 14) * (TB * 32) * 128   # conv1 height shift + pool
        + (TB * 14) * 128 * 640             # conv2 slab matmul
        + 5 * (5 * TB) * (TB * 14) * 128    # conv2 height shift + pool
        + 7 * TB * 128 * 128)               # fc1 (5 blocks) + fc2 + fc3
    flops = int(per_step_flops * steps)
    bytes_accessed = int(4 * Bp * (3 * 32 * 32 + 128)
                         + sum(int(w.size) * w.dtype.itemsize for w in weights))

    out = pl.pallas_call(
        _lenet5_kernel,
        out_shape=jax.ShapeDtypeStruct((Bp, 128), jnp.float32),
        grid=(steps,),
        in_specs=in_specs,
        out_specs=out_specs,
        compiler_params=pltpu.CompilerParams(
            dimension_semantics=("parallel",),
            vmem_limit_bytes=32 * 1024 * 1024),
        cost_estimate=pl.CostEstimate(flops=flops, transcendentals=0,
                                      bytes_accessed=bytes_accessed),
    )(x, *weights)
    return out[:B, :10]


# ------------------------------- params --------------------------------------

def init_params(key):
    ks = jax.random.split(key, 10)

    def u(k, shape, fan_in):
        bound = 1.0 / jnp.sqrt(jnp.float32(fan_in))
        return jax.random.uniform(k, shape, jnp.float32, -bound, bound)

    return {
        "conv1_w": u(ks[0], (6, 3, 5, 5), 3 * 25),
        "conv1_b": u(ks[1], (6,), 3 * 25),
        "conv2_w": u(ks[2], (16, 6, 5, 5), 6 * 25),
        "conv2_b": u(ks[3], (16,), 6 * 25),
        "fc1_w": u(ks[4], (400, 120), 400),
        "fc1_b": u(ks[5], (120,), 400),
        "fc2_w": u(ks[6], (120, 84), 120),
        "fc2_b": u(ks[7], (84,), 120),
        "fc3_w": u(ks[8], (84, 10), 84),
        "fc3_b": u(ks[9], (10,), 84),
    }


# ------------------------ pure-JAX reference (check) -------------------------

def lenet5_ref(params, x_nchw):
    def conv(x, w, b):
        y = jax.lax.conv_general_dilated(
            x, w, (1, 1), "VALID",
            dimension_numbers=("NCHW", "OIHW", "NCHW"))
        return y + b.reshape(1, -1, 1, 1)

    def pool(x):
        return jax.lax.reduce_window(
            x, 0.0, jax.lax.add, (1, 1, 2, 2), (1, 1, 2, 2), "VALID") * 0.25

    x = pool(conv(x_nchw, params["conv1_w"], params["conv1_b"]))
    x = pool(conv(x, params["conv2_w"], params["conv2_b"]))
    x = x.reshape(x.shape[0], -1)
    x = jnp.maximum(x @ params["fc1_w"] + params["fc1_b"], 0.0)
    x = jnp.maximum(x @ params["fc2_w"] + params["fc2_b"], 0.0)
    return x @ params["fc3_w"] + params["fc3_b"]


if __name__ == "__main__":
    key = jax.random.PRNGKey(0)
    pkey, xkey = jax.random.split(key)
    params = init_params(pkey)
    x = jax.random.normal(xkey, (2, 3, 32, 32), jnp.float32)

    logits = jax.jit(lenet5_forward)(params, x)
    jax.block_until_ready(logits)
    assert logits.shape == (2, 10), logits.shape

    ref = lenet5_ref(params, x)
    err = float(jnp.max(jnp.abs(logits - ref)))
    scale = float(jnp.max(jnp.abs(ref)))
    # bf16 MXU operands with f32 accumulation: ~1% relative error budget,
    # far tighter than the previous 1e-2 absolute tolerance.
    assert err <= 2e-2 * scale + 1e-3, f"mismatch: err={err} scale={scale}"

    print("KERNEL_OK")
</pallas_src>

<mosaic_0001>
module attributes {stable_mosaic.version = 11 : i64} {
  func.func @_lenet5_kernel(%arg0: i32, %arg1: memref<2x3x32x32xf32, #tpu.memory_space<vmem>>, %arg2: memref<3x32x640xbf16, #tpu.memory_space<vmem>>, %arg3: memref<5x28x64xbf16, #tpu.memory_space<vmem>>, %arg4: memref<128x640xbf16, #tpu.memory_space<vmem>>, %arg5: memref<5x10x28xbf16, #tpu.memory_space<vmem>>, %arg6: memref<7x128x128xbf16, #tpu.memory_space<vmem>>, %arg7: memref<8x128xf32, #tpu.memory_space<vmem>>, %arg8: memref<2x128xf32, #tpu.memory_space<vmem>>) attributes {dimension_semantics = [#tpu.dimension_semantics<parallel>], iteration_bounds = array<i64: 1>, scalar_prefetch = 0 : i64, scratch_operands = 0 : i64, tpu.core_type = #tpu.core_type<tc>, window_params = [{transform_indices = @transform_0, window_bounds = array<i64: 2, 3, 32, 32>}, {pipeline_mode = #tpu.pipeline_mode<synchronous>, transform_indices = @transform_1, window_bounds = array<i64: 3, 32, 640>}, {pipeline_mode = #tpu.pipeline_mode<synchronous>, transform_indices = @transform_2, window_bounds = array<i64: 5, 28, 64>}, {pipeline_mode = #tpu.pipeline_mode<synchronous>, transform_indices = @transform_3, window_bounds = array<i64: 128, 640>}, {pipeline_mode = #tpu.pipeline_mode<synchronous>, transform_indices = @transform_4, window_bounds = array<i64: 5, 10, 28>}, {pipeline_mode = #tpu.pipeline_mode<synchronous>, transform_indices = @transform_5, window_bounds = array<i64: 7, 128, 128>}, {pipeline_mode = #tpu.pipeline_mode<synchronous>, transform_indices = @transform_6, window_bounds = array<i64: 8, 128>}, {transform_indices = @transform_7, window_bounds = array<i64: 2, 128>}]} {
    %c0 = arith.constant 0 : index
    %c0_0 = arith.constant 0 : index
    %0 = vector.load %arg7[%c0, %c0_0] : memref<8x128xf32, #tpu.memory_space<vmem>>, vector<8x128xf32>
    %c0_1 = arith.constant 0 : index
    %c0_2 = arith.constant 0 : index
    %c0_3 = arith.constant 0 : index
    %c0_4 = arith.constant 0 : index
    %1 = vector.load %arg1[%c0_1, %c0_2, %c0_3, %c0_4] : memref<2x3x32x32xf32, #tpu.memory_space<vmem>>, vector<2x3x32x32xf32>
    %2 = vector.extract_strided_slice %1 {offsets = [0, 0, 0, 0], sizes = [2, 1, 32, 32], strides = [1, 1, 1, 1]} : vector<2x3x32x32xf32> to vector<2x1x32x32xf32>
    %3 = vector.shape_cast %2 : vector<2x1x32x32xf32> to vector<2x32x32xf32>
    %4 = vector.shape_cast %3 : vector<2x32x32xf32> to vector<64x32xf32>
    %5 = arith.truncf %4 : vector<64x32xf32> to vector<64x32xbf16>
    %c0_5 = arith.constant 0 : index
    %c0_6 = arith.constant 0 : index
    %c0_7 = arith.constant 0 : index
    %6 = vector.load %arg2[%c0_5, %c0_6, %c0_7] : memref<3x32x640xbf16, #tpu.memory_space<vmem>>, vector<1x32x640xbf16>
    %7 = vector.shape_cast %6 : vector<1x32x640xbf16> to vector<32x640xbf16>
    %cst = arith.constant dense<0.000000e+00> : vector<64x640xf32>
    %8 = tpu.matmul %5, %7, %cst {dimension_numbers = #tpu.dot_dimension_numbers<[1], [0], [0], [1], [0, 0, 1, 1], [], []>} : vector<64x32xbf16>, vector<32x640xbf16>, vector<64x640xf32> -> vector<64x640xf32>
    %9 = vector.extract_strided_slice %1 {offsets = [0, 1, 0, 0], sizes = [2, 1, 32, 32], strides = [1, 1, 1, 1]} : vector<2x3x32x32xf32> to vector<2x1x32x32xf32>
    %10 = vector.shape_cast %9 : vector<2x1x32x32xf32> to vector<2x32x32xf32>
    %11 = vector.shape_cast %10 : vector<2x32x32xf32> to vector<64x32xf32>
    %12 = arith.truncf %11 : vector<64x32xf32> to vector<64x32xbf16>
    %c1 = arith.constant 1 : index
    %c0_8 = arith.constant 0 : index
    %c0_9 = arith.constant 0 : index
    %13 = vector.load %arg2[%c1, %c0_8, %c0_9] : memref<3x32x640xbf16, #tpu.memory_space<vmem>>, vector<1x32x640xbf16>
    %14 = vector.shape_cast %13 : vector<1x32x640xbf16> to vector<32x640xbf16>
    %cst_10 = arith.constant dense<0.000000e+00> : vector<64x640xf32>
    %15 = tpu.matmul %12, %14, %cst_10 {dimension_numbers = #tpu.dot_dimension_numbers<[1], [0], [0], [1], [0, 0, 1, 1], [], []>} : vector<64x32xbf16>, vector<32x640xbf16>, vector<64x640xf32> -> vector<64x640xf32>
    %16 = arith.addf %8, %15 : vector<64x640xf32>
    %17 = vector.extract_strided_slice %1 {offsets = [0, 2, 0, 0], sizes = [2, 1, 32, 32], strides = [1, 1, 1, 1]} : vector<2x3x32x32xf32> to vector<2x1x32x32xf32>
    %18 = vector.shape_cast %17 : vector<2x1x32x32xf32> to vector<2x32x32xf32>
    %19 = vector.shape_cast %18 : vector<2x32x32xf32> to vector<64x32xf32>
    %20 = arith.truncf %19 : vector<64x32xf32> to vector<64x32xbf16>
    %c2 = arith.constant 2 : index
    %c0_11 = arith.constant 0 : index
    %c0_12 = arith.constant 0 : index
    %21 = vector.load %arg2[%c2, %c0_11, %c0_12] : memref<3x32x640xbf16, #tpu.memory_space<vmem>>, vector<1x32x640xbf16>
    %22 = vector.shape_cast %21 : vector<1x32x640xbf16> to vector<32x640xbf16>
    %cst_13 = arith.constant dense<0.000000e+00> : vector<64x640xf32>
    %23 = tpu.matmul %20, %22, %cst_13 {dimension_numbers = #tpu.dot_dimension_numbers<[1], [0], [0], [1], [0, 0, 1, 1], [], []>} : vector<64x32xbf16>, vector<32x640xbf16>, vector<64x640xf32> -> vector<64x640xf32>
    %24 = arith.addf %16, %23 : vector<64x640xf32>
    %25 = arith.truncf %24 : vector<64x640xf32> to vector<64x640xbf16>
    %c0_14 = arith.constant 0 : index
    %c0_15 = arith.constant 0 : index
    %c0_16 = arith.constant 0 : index
    %26 = vector.load %arg3[%c0_14, %c0_15, %c0_16] : memref<5x28x64xbf16, #tpu.memory_space<vmem>>, vector<1x28x64xbf16>
    %27 = vector.shape_cast %26 : vector<1x28x64xbf16> to vector<28x64xbf16>
    %28 = vector.extract_strided_slice %25 {offsets = [0, 0], sizes = [64, 128], strides = [1, 1]} : vector<64x640xbf16> to vector<64x128xbf16>
    %cst_17 = arith.constant dense<0.000000e+00> : vector<28x128xf32>
    %29 = tpu.matmul %27, %28, %cst_17 {dimension_numbers = #tpu.dot_dimension_numbers<[1], [0], [0], [1], [0, 0, 1, 1], [], []>} : vector<28x64xbf16>, vector<64x128xbf16>, vector<28x128xf32> -> vector<28x128xf32>
    %c1_18 = arith.constant 1 : index
    %c0_19 = arith.constant 0 : index
    %c0_20 = arith.constant 0 : index
    %30 = vector.load %arg3[%c1_18, %c0_19, %c0_20] : memref<5x28x64xbf16, #tpu.memory_space<vmem>>, vector<1x28x64xbf16>
    %31 = vector.shape_cast %30 : vector<1x28x64xbf16> to vector<28x64xbf16>
    %32 = vector.extract_strided_slice %25 {offsets = [0, 128], sizes = [64, 128], strides = [1, 1]} : vector<64x640xbf16> to vector<64x128xbf16>
    %cst_21 = arith.constant dense<0.000000e+00> : vector<28x128xf32>
    %33 = tpu.matmul %31, %32, %cst_21 {dimension_numbers = #tpu.dot_dimension_numbers<[1], [0], [0], [1], [0, 0, 1, 1], [], []>} : vector<28x64xbf16>, vector<64x128xbf16>, vector<28x128xf32> -> vector<28x128xf32>
    %34 = arith.addf %29, %33 : vector<28x128xf32>
    %c2_22 = arith.constant 2 : index
    %c0_23 = arith.constant 0 : index
    %c0_24 = arith.constant 0 : index
    %35 = vector.load %arg3[%c2_22, %c0_23, %c0_24] : memref<5x28x64xbf16, #tpu.memory_space<vmem>>, vector<1x28x64xbf16>
    %36 = vector.shape_cast %35 : vector<1x28x64xbf16> to vector<28x64xbf16>
    %37 = vector.extract_strided_slice %25 {offsets = [0, 256], sizes = [64, 128], strides = [1, 1]} : vector<64x640xbf16> to vector<64x128xbf16>
    %cst_25 = arith.constant dense<0.000000e+00> : vector<28x128xf32>
    %38 = tpu.matmul %36, %37, %cst_25 {dimension_numbers = #tpu.dot_dimension_numbers<[1], [0], [0], [1], [0, 0, 1, 1], [], []>} : vector<28x64xbf16>, vector<64x128xbf16>, vector<28x128xf32> -> vector<28x128xf32>
    %39 = arith.addf %34, %38 : vector<28x128xf32>
    %c3 = arith.constant 3 : index
    %c0_26 = arith.constant 0 : index
    %c0_27 = arith.constant 0 : index
    %40 = vector.load %arg3[%c3, %c0_26, %c0_27] : memref<5x28x64xbf16, #tpu.memory_space<vmem>>, vector<1x28x64xbf16>
    %41 = vector.shape_cast %40 : vector<1x28x64xbf16> to vector<28x64xbf16>
    %42 = vector.extract_strided_slice %25 {offsets = [0, 384], sizes = [64, 128], strides = [1, 1]} : vector<64x640xbf16> to vector<64x128xbf16>
    %cst_28 = arith.constant dense<0.000000e+00> : vector<28x128xf32>
    %43 = tpu.matmul %41, %42, %cst_28 {dimension_numbers = #tpu.dot_dimension_numbers<[1], [0], [0], [1], [0, 0, 1, 1], [], []>} : vector<28x64xbf16>, vector<64x128xbf16>, vector<28x128xf32> -> vector<28x128xf32>
    %44 = arith.addf %39, %43 : vector<28x128xf32>
    %c4 = arith.constant 4 : index
    %c0_29 = arith.constant 0 : index
    %c0_30 = arith.constant 0 : index
    %45 = vector.load %arg3[%c4, %c0_29, %c0_30] : memref<5x28x64xbf16, #tpu.memory_space<vmem>>, vector<1x28x64xbf16>
    %46 = vector.shape_cast %45 : vector<1x28x64xbf16> to vector<28x64xbf16>
    %47 = vector.extract_strided_slice %25 {offsets = [0, 512], sizes = [64, 128], strides = [1, 1]} : vector<64x640xbf16> to vector<64x128xbf16>
    %cst_31 = arith.constant dense<0.000000e+00> : vector<28x128xf32>
    %48 = tpu.matmul %46, %47, %cst_31 {dimension_numbers = #tpu.dot_dimension_numbers<[1], [0], [0], [1], [0, 0, 1, 1], [], []>} : vector<28x64xbf16>, vector<64x128xbf16>, vector<28x128xf32> -> vector<28x128xf32>
    %49 = arith.addf %44, %48 : vector<28x128xf32>
    %50 = vector.extract_strided_slice %0 {offsets = [0, 0], sizes = [1, 128], strides = [1, 1]} : vector<8x128xf32> to vector<1x128xf32>
    %51 = vector.broadcast %50 : vector<1x128xf32> to vector<28x128xf32>
    %52 = arith.addf %49, %51 : vector<28x128xf32>
    %53 = arith.truncf %52 : vector<28x128xf32> to vector<28x128xbf16>
    %c0_32 = arith.constant 0 : index
    %c0_33 = arith.constant 0 : index
    %54 = vector.load %arg4[%c0_32, %c0_33] : memref<128x640xbf16, #tpu.memory_space<vmem>>, vector<128x640xbf16>
    %cst_34 = arith.constant dense<0.000000e+00> : vector<28x640xf32>
    %55 = tpu.matmul %53, %54, %cst_34 {dimension_numbers = #tpu.dot_dimension_numbers<[1], [0], [0], [1], [0, 0, 1, 1], [], []>} : vector<28x128xbf16>, vector<128x640xbf16>, vector<28x640xf32> -> vector<28x640xf32>
    %56 = arith.truncf %55 : vector<28x640xf32> to vector<28x640xbf16>
    %c0_35 = arith.constant 0 : index
    %c0_36 = arith.constant 0 : index
    %c0_37 = arith.constant 0 : index
    %57 = vector.load %arg5[%c0_35, %c0_36, %c0_37] : memref<5x10x28xbf16, #tpu.memory_space<vmem>>, vector<1x10x28xbf16>
    %58 = vector.shape_cast %57 : vector<1x10x28xbf16> to vector<10x28xbf16>
    %59 = vector.extract_strided_slice %56 {offsets = [0, 0], sizes = [28, 128], strides = [1, 1]} : vector<28x640xbf16> to vector<28x128xbf16>
    %cst_38 = arith.constant dense<0.000000e+00> : vector<10x128xf32>
    %60 = tpu.matmul %58, %59, %cst_38 {dimension_numbers = #tpu.dot_dimension_numbers<[1], [0], [0], [1], [0, 0, 1, 1], [], []>} : vector<10x28xbf16>, vector<28x128xbf16>, vector<10x128xf32> -> vector<10x128xf32>
    %c1_39 = arith.constant 1 : index
    %c0_40 = arith.constant 0 : index
    %c0_41 = arith.constant 0 : index
    %61 = vector.load %arg5[%c1_39, %c0_40, %c0_41] : memref<5x10x28xbf16, #tpu.memory_space<vmem>>, vector<1x10x28xbf16>
    %62 = vector.shape_cast %61 : vector<1x10x28xbf16> to vector<10x28xbf16>
    %63 = vector.extract_strided_slice %56 {offsets = [0, 128], sizes = [28, 128], strides = [1, 1]} : vector<28x640xbf16> to vector<28x128xbf16>
    %cst_42 = arith.constant dense<0.000000e+00> : vector<10x128xf32>
    %64 = tpu.matmul %62, %63, %cst_42 {dimension_numbers = #tpu.dot_dimension_numbers<[1], [0], [0], [1], [0, 0, 1, 1], [], []>} : vector<10x28xbf16>, vector<28x128xbf16>, vector<10x128xf32> -> vector<10x128xf32>
    %65 = arith.addf %60, %64 : vector<10x128xf32>
    %c2_43 = arith.constant 2 : index
    %c0_44 = arith.constant 0 : index
    %c0_45 = arith.constant 0 : index
    %66 = vector.load %arg5[%c2_43, %c0_44, %c0_45] : memref<5x10x28xbf16, #tpu.memory_space<vmem>>, vector<1x10x28xbf16>
    %67 = vector.shape_cast %66 : vector<1x10x28xbf16> to vector<10x28xbf16>
    %68 = vector.extract_strided_slice %56 {offsets = [0, 256], sizes = [28, 128], strides = [1, 1]} : vector<28x640xbf16> to vector<28x128xbf16>
    %cst_46 = arith.constant dense<0.000000e+00> : vector<10x128xf32>
    %69 = tpu.matmul %67, %68, %cst_46 {dimension_numbers = #tpu.dot_dimension_numbers<[1], [0], [0], [1], [0, 0, 1, 1], [], []>} : vector<10x28xbf16>, vector<28x128xbf16>, vector<10x128xf32> -> vector<10x128xf32>
    %70 = arith.addf %65, %69 : vector<10x128xf32>
    %c3_47 = arith.constant 3 : index
    %c0_48 = arith.constant 0 : index
    %c0_49 = arith.constant 0 : index
    %71 = vector.load %arg5[%c3_47, %c0_48, %c0_49] : memref<5x10x28xbf16, #tpu.memory_space<vmem>>, vector<1x10x28xbf16>
    %72 = vector.shape_cast %71 : vector<1x10x28xbf16> to vector<10x28xbf16>
    %73 = vector.extract_strided_slice %56 {offsets = [0, 384], sizes = [28, 128], strides = [1, 1]} : vector<28x640xbf16> to vector<28x128xbf16>
    %cst_50 = arith.constant dense<0.000000e+00> : vector<10x128xf32>
    %74 = tpu.matmul %72, %73, %cst_50 {dimension_numbers = #tpu.dot_dimension_numbers<[1], [0], [0], [1], [0, 0, 1, 1], [], []>} : vector<10x28xbf16>, vector<28x128xbf16>, vector<10x128xf32> -> vector<10x128xf32>
    %75 = arith.addf %70, %74 : vector<10x128xf32>
    %c4_51 = arith.constant 4 : index
    %c0_52 = arith.constant 0 : index
    %c0_53 = arith.constant 0 : index
    %76 = vector.load %arg5[%c4_51, %c0_52, %c0_53] : memref<5x10x28xbf16, #tpu.memory_space<vmem>>, vector<1x10x28xbf16>
    %77 = vector.shape_cast %76 : vector<1x10x28xbf16> to vector<10x28xbf16>
    %78 = vector.extract_strided_slice %56 {offsets = [0, 512], sizes = [28, 128], strides = [1, 1]} : vector<28x640xbf16> to vector<28x128xbf16>
    %cst_54 = arith.constant dense<0.000000e+00> : vector<10x128xf32>
    %79 = tpu.matmul %77, %78, %cst_54 {dimension_numbers = #tpu.dot_dimension_numbers<[1], [0], [0], [1], [0, 0, 1, 1], [], []>} : vector<10x28xbf16>, vector<28x128xbf16>, vector<10x128xf32> -> vector<10x128xf32>
    %80 = arith.addf %75, %79 : vector<10x128xf32>
    %81 = vector.extract_strided_slice %0 {offsets = [1, 0], sizes = [1, 128], strides = [1, 1]} : vector<8x128xf32> to vector<1x128xf32>
    %82 = vector.broadcast %81 : vector<1x128xf32> to vector<10x128xf32>
    %83 = arith.addf %80, %82 : vector<10x128xf32>
    %84 = arith.truncf %83 : vector<10x128xf32> to vector<10x128xbf16>
    %85 = vector.extract_strided_slice %84 {offsets = [0, 0], sizes = [2, 128], strides = [1, 1]} : vector<10x128xbf16> to vector<2x128xbf16>
    %c0_55 = arith.constant 0 : index
    %c0_56 = arith.constant 0 : index
    %c0_57 = arith.constant 0 : index
    %86 = vector.load %arg6[%c0_55, %c0_56, %c0_57] : memref<7x128x128xbf16, #tpu.memory_space<vmem>>, vector<1x128x128xbf16>
    %87 = vector.shape_cast %86 : vector<1x128x128xbf16> to vector<128x128xbf16>
    %cst_58 = arith.constant dense<0.000000e+00> : vector<2x128xf32>
    %88 = tpu.matmul %85, %87, %cst_58 {dimension_numbers = #tpu.dot_dimension_numbers<[1], [0], [0], [1], [0, 0, 1, 1], [], []>} : vector<2x128xbf16>, vector<128x128xbf16>, vector<2x128xf32> -> vector<2x128xf32>
    %89 = vector.extract_strided_slice %84 {offsets = [2, 0], sizes = [2, 128], strides = [1, 1]} : vector<10x128xbf16> to vector<2x128xbf16>
    %c1_59 = arith.constant 1 : index
    %c0_60 = arith.constant 0 : index
    %c0_61 = arith.constant 0 : index
    %90 = vector.load %arg6[%c1_59, %c0_60, %c0_61] : memref<7x128x128xbf16, #tpu.memory_space<vmem>>, vector<1x128x128xbf16>
    %91 = vector.shape_cast %90 : vector<1x128x128xbf16> to vector<128x128xbf16>
    %cst_62 = arith.constant dense<0.000000e+00> : vector<2x128xf32>
    %92 = tpu.matmul %89, %91, %cst_62 {dimension_numbers = #tpu.dot_dimension_numbers<[1], [0], [0], [1], [0, 0, 1, 1], [], []>} : vector<2x128xbf16>, vector<128x128xbf16>, vector<2x128xf32> -> vector<2x128xf32>
    %93 = arith.addf %88, %92 : vector<2x128xf32>
    %94 = vector.extract_strided_slice %84 {offsets = [4, 0], sizes = [2, 128], strides = [1, 1]} : vector<10x128xbf16> to vector<2x128xbf16>
    %c2_63 = arith.constant 2 : index
    %c0_64 = arith.constant 0 : index
    %c0_65 = arith.constant 0 : index
    %95 = vector.load %arg6[%c2_63, %c0_64, %c0_65] : memref<7x128x128xbf16, #tpu.memory_space<vmem>>, vector<1x128x128xbf16>
    %96 = vector.shape_cast %95 : vector<1x128x128xbf16> to vector<128x128xbf16>
    %cst_66 = arith.constant dense<0.000000e+00> : vector<2x128xf32>
    %97 = tpu.matmul %94, %96, %cst_66 {dimension_numbers = #tpu.dot_dimension_numbers<[1], [0], [0], [1], [0, 0, 1, 1], [], []>} : vector<2x128xbf16>, vector<128x128xbf16>, vector<2x128xf32> -> vector<2x128xf32>
    %98 = arith.addf %93, %97 : vector<2x128xf32>
    %99 = vector.extract_strided_slice %84 {offsets = [6, 0], sizes = [2, 128], strides = [1, 1]} : vector<10x128xbf16> to vector<2x128xbf16>
    %c3_67 = arith.constant 3 : index
    %c0_68 = arith.constant 0 : index
    %c0_69 = arith.constant 0 : index
    %100 = vector.load %arg6[%c3_67, %c0_68, %c0_69] : memref<7x128x128xbf16, #tpu.memory_space<vmem>>, vector<1x128x128xbf16>
    %101 = vector.shape_cast %100 : vector<1x128x128xbf16> to vector<128x128xbf16>
    %cst_70 = arith.constant dense<0.000000e+00> : vector<2x128xf32>
    %102 = tpu.matmul %99, %101, %cst_70 {dimension_numbers = #tpu.dot_dimension_numbers<[1], [0], [0], [1], [0, 0, 1, 1], [], []>} : vector<2x128xbf16>, vector<128x128xbf16>, vector<2x128xf32> -> vector<2x128xf32>
    %103 = arith.addf %98, %102 : vector<2x128xf32>
    %104 = vector.extract_strided_slice %84 {offsets = [8, 0], sizes = [2, 128], strides = [1, 1]} : vector<10x128xbf16> to vector<2x128xbf16>
    %c4_71 = arith.constant 4 : index
    %c0_72 = arith.constant 0 : index
    %c0_73 = arith.constant 0 : index
    %105 = vector.load %arg6[%c4_71, %c0_72, %c0_73] : memref<7x128x128xbf16, #tpu.memory_space<vmem>>, vector<1x128x128xbf16>
    %106 = vector.shape_cast %105 : vector<1x128x128xbf16> to vector<128x128xbf16>
    %cst_74 = arith.constant dense<0.000000e+00> : vector<2x128xf32>
    %107 = tpu.matmul %104, %106, %cst_74 {dimension_numbers = #tpu.dot_dimension_numbers<[1], [0], [0], [1], [0, 0, 1, 1], [], []>} : vector<2x128xbf16>, vector<128x128xbf16>, vector<2x128xf32> -> vector<2x128xf32>
    %108 = arith.addf %103, %107 : vector<2x128xf32>
    %109 = vector.extract_strided_slice %0 {offsets = [2, 0], sizes = [1, 128], strides = [1, 1]} : vector<8x128xf32> to vector<1x128xf32>
    %110 = vector.broadcast %109 : vector<1x128xf32> to vector<2x128xf32>
    %111 = arith.addf %108, %110 : vector<2x128xf32>
    %cst_75 = arith.constant 0.000000e+00 : f32
    %112 = vector.broadcast %cst_75 : f32 to vector<2x128xf32>
    %113 = arith.maximumf %111, %112 : vector<2x128xf32>
    %114 = arith.truncf %113 : vector<2x128xf32> to vector<2x128xbf16>
    %c5 = arith.constant 5 : index
    %c0_76 = arith.constant 0 : index
    %c0_77 = arith.constant 0 : index
    %115 = vector.load %arg6[%c5, %c0_76, %c0_77] : memref<7x128x128xbf16, #tpu.memory_space<vmem>>, vector<1x128x128xbf16>
    %116 = vector.shape_cast %115 : vector<1x128x128xbf16> to vector<128x128xbf16>
    %cst_78 = arith.constant dense<0.000000e+00> : vector<2x128xf32>
    %117 = tpu.matmul %114, %116, %cst_78 {dimension_numbers = #tpu.dot_dimension_numbers<[1], [0], [0], [1], [0, 0, 1, 1], [], []>} : vector<2x128xbf16>, vector<128x128xbf16>, vector<2x128xf32> -> vector<2x128xf32>
    %118 = vector.extract_strided_slice %0 {offsets = [3, 0], sizes = [1, 128], strides = [1, 1]} : vector<8x128xf32> to vector<1x128xf32>
    %119 = vector.broadcast %118 : vector<1x128xf32> to vector<2x128xf32>
    %120 = arith.addf %117, %119 : vector<2x128xf32>
    %cst_79 = arith.constant 0.000000e+00 : f32
    %121 = vector.broadcast %cst_79 : f32 to vector<2x128xf32>
    %122 = arith.maximumf %120, %121 : vector<2x128xf32>
    %123 = arith.truncf %122 : vector<2x128xf32> to vector<2x128xbf16>
    %c6 = arith.constant 6 : index
    %c0_80 = arith.constant 0 : index
    %c0_81 = arith.constant 0 : index
    %124 = vector.load %arg6[%c6, %c0_80, %c0_81] : memref<7x128x128xbf16, #tpu.memory_space<vmem>>, vector<1x128x128xbf16>
    %125 = vector.shape_cast %124 : vector<1x128x128xbf16> to vector<128x128xbf16>
    %cst_82 = arith.constant dense<0.000000e+00> : vector<2x128xf32>
    %126 = tpu.matmul %123, %125, %cst_82 {dimension_numbers = #tpu.dot_dimension_numbers<[1], [0], [0], [1], [0, 0, 1, 1], [], []>} : vector<2x128xbf16>, vector<128x128xbf16>, vector<2x128xf32> -> vector<2x128xf32>
    %127 = vector.extract_strided_slice %0 {offsets = [4, 0], sizes = [1, 128], strides = [1, 1]} : vector<8x128xf32> to vector<1x128xf32>
    %128 = vector.broadcast %127 : vector<1x128xf32> to vector<2x128xf32>
    %129 = arith.addf %126, %128 : vector<2x128xf32>
    %c0_83 = arith.constant 0 : index
    %c0_84 = arith.constant 0 : index
    %130 = vector.load %arg8[%c0_83, %c0_84] : memref<2x128xf32, #tpu.memory_space<vmem>>, vector<2x128xf32>
    tpu.vector_store %arg8[%c0_83, %c0_84], %129 {strides = array<i32>} : memref<2x128xf32, #tpu.memory_space<vmem>>, vector<2x128xf32>,
    return
  }
  func.func @transform_0(%arg0: i32) -> (i32, i32, i32, i32) {
    %c0_i32 = arith.constant 0 : i32
    %c0_i32_0 = arith.constant 0 : i32
    %c0_i32_1 = arith.constant 0 : i32
    %c0_i32_2 = arith.constant 0 : i32
    return %arg0, %c0_i32, %c0_i32_0, %c0_i32_1 : i32, i32, i32, i32
  }
  func.func @transform_1(%arg0: i32) -> (i32, i32, i32) {
    %c0_i32 = arith.constant 0 : i32
    %c0_i32_0 = arith.constant 0 : i32
    %c0_i32_1 = arith.constant 0 : i32
    %c0_i32_2 = arith.constant 0 : i32
    return %c0_i32, %c0_i32_0, %c0_i32_1 : i32, i32, i32
  }
  func.func @transform_2(%arg0: i32) -> (i32, i32, i32) {
    %c0_i32 = arith.constant 0 : i32
    %c0_i32_0 = arith.constant 0 : i32
    %c0_i32_1 = arith.constant 0 : i32
    %c0_i32_2 = arith.constant 0 : i32
    return %c0_i32, %c0_i32_0, %c0_i32_1 : i32, i32, i32
  }
  func.func @transform_3(%arg0: i32) -> (i32, i32) {
    %c0_i32 = arith.constant 0 : i32
    %c0_i32_0 = arith.constant 0 : i32
    %c0_i32_1 = arith.constant 0 : i32
    return %c0_i32, %c0_i32_0 : i32, i32
  }
  func.func @transform_4(%arg0: i32) -> (i32, i32, i32) {
    %c0_i32 = arith.constant 0 : i32
    %c0_i32_0 = arith.constant 0 : i32
    %c0_i32_1 = arith.constant 0 : i32
    %c0_i32_2 = arith.constant 0 : i32
    return %c0_i32, %c0_i32_0, %c0_i32_1 : i32, i32, i32
  }
  func.func @transform_5(%arg0: i32) -> (i32, i32, i32) {
    %c0_i32 = arith.constant 0 : i32
    %c0_i32_0 = arith.constant 0 : i32
    %c0_i32_1 = arith.constant 0 : i32
    %c0_i32_2 = arith.constant 0 : i32
    return %c0_i32, %c0_i32_0, %c0_i32_1 : i32, i32, i32
  }
  func.func @transform_6(%arg0: i32) -> (i32, i32) {
    %c0_i32 = arith.constant 0 : i32
    %c0_i32_0 = arith.constant 0 : i32
    %c0_i32_1 = arith.constant 0 : i32
    return %c0_i32, %c0_i32_0 : i32, i32
  }
  func.func @transform_7(%arg0: i32) -> (i32, i32) {
    %c0_i32 = arith.constant 0 : i32
    %c0_i32_0 = arith.constant 0 : i32
    return %arg0, %c0_i32 : i32, i32
  }
}

</mosaic_0001>

<bundles_post_ra>
// kernel: tile.13
= control target key start
LH: loop header
LB: loop body
LE: loop exit
PB: predicated region body
PF: predicated region fallthrough
CT: control target
= control target key end

     0   :  { %s28_s0 = inlined_call_operand.vmem [shape: f32[6], index: 0, kind: input, shape index: {}]   ;;  %s29_s1 = inlined_call_operand.vmem [shape: f32[14,6], index: 1, kind: output, shape index: {}]  }
   0x1   :  { %v4_v0 = vld [vmem:[%s28_s0] ss:$0 sm:$0xff] }
   0x2   :  { %5 = vst [vmem:[%s29_s1] sm:$0xff] %v4_v0 }
   0x3   :  { %8 = vst [vmem:[%s29_s1 + $0x8] sm:$0xff] %v4_v0 }

// kernel: tile.18
= control target key start
LH: loop header
LB: loop body
LE: loop exit
PB: predicated region body
PF: predicated region fallthrough
CT: control target
= control target key end

     0   :  { %s22_s0 = inlined_call_operand.vmem [shape: f32[16], index: 0, kind: input, shape index: {}]   ;;  %s23_s1 = inlined_call_operand.vmem [shape: f32[5,16], index: 1, kind: output, shape index: {}]  }
   0x1   :  { %v4_v0 = vld [vmem:[%s22_s0] ss:$0 sm:$0xff] }
   0x2   :  { %5 = vst [vmem:[%s23_s1] sm:$0xff] %v4_v0 }

// kernel: lenet5_forward.1
= control target key start
LH: loop header
LB: loop body
LE: loop exit
PB: predicated region body
PF: predicated region fallthrough
CT: control target
= control target key end

     0   :  { %vm138_vm0 = vcmask 261120   ;;  %s4397_s0 = inlined_call_operand.vmem [shape: f32[2,3,32,32], index: 0, kind: input, shape index: {}]   ;;  %s4398_s1 = inlined_call_operand.vmem [shape: bf16[3,32,640], index: 1, kind: input, shape index: {}]   ;;  %s4399_s2 = inlined_call_operand.vmem [shape: bf16[5,28,64], index: 2, kind: input, shape index: {}]   ;;  %s4400_s3 = inlined_call_operand.vmem [shape: bf16[128,640], index: 3, kind: input, shape index: {}]   ;;  %s4401_s4 = inlined_call_operand.vmem [shape: bf16[5,10,28], index: 4, kind: input, shape index: {}]   ;;  %s4402_s5 = inlined_call_operand.vmem [shape: bf16[7,128,128], index: 5, kind: input, shape index: {}]   ;;  %s4403_s6 = inlined_call_operand.vmem [shape: f32[8,128], index: 6, kind: input, shape index: {}]   ;;  %s4404_s7 = inlined_call_operand.hbm [shape: f32[2,128], index: 7, kind: output, shape index: {}]  }
   0x1   :  { %v2296_v0 = vld [vmem:[%s4398_s1 + $0x78] sm:$0xf]  ;;  %v3062_v1 = vld [vmem:[%s4398_s1 + $0x88] sm:$0xf0]  ;;  %v3060_v2 = vld [vmem:[%s4398_s1 + $0x7c] sm:$0xf] }
   0x2   :  { %v2297_v3 = vor.u32 %v3062_v1, %v2296_v0  ;;  %v2298_v4 = vld [vmem:[%s4398_s1 + $0x8c] sm:$0xf0]  ;;  %v2304_v5 = vld [vmem:[%s4398_s1 + $0x80] sm:$0xf]  ;;  %v3063_v6 = vld [vmem:[%s4398_s1 + $0x90] sm:$0xf0] }
   0x3   :  { %v2301_v7 = vor.u32 %v3060_v2, %v2298_v4  ;;  %v2305_v8 = vor.u32 %v3063_v6, %v2304_v5  ;;  %v3061_v9 = vld [vmem:[%s4398_s1 + $0x84] sm:$0xf]  ;;  %v2306_v10 = vld [vmem:[%s4398_s1 + $0x94] sm:$0xf0]  ;;  %v2276_v11 = vld [vmem:[%s4398_s1 + $0x50] sm:$0xf] }
   0x4   :  { %157 = vmatpush.bf16.msra.mxu0 %v2297_v3  ;;  %v2309_v12 = vor.u32 %v3061_v9, %v2306_v10  ;;  %v3057_v13 = vld [vmem:[%s4398_s1 + $0x60] sm:$0xf0]  ;;  %v3055_v14 = vld [vmem:[%s4398_s1 + $0x54] sm:$0xf]  ;;  %v2278_v15 = vld [vmem:[%s4398_s1 + $0x64] sm:$0xf0] }
   0x5   :  { %186 = vmatpush.bf16.msra.mxu1 %v2301_v7  ;;  %215 = vmatpush.bf16.msra.mxu2 %v2305_v8  ;;  %v2277_v16 = vor.u32 %v3057_v13, %v2276_v11  ;;  %v2281_v17 = vor.u32 %v3055_v14, %v2278_v15  ;;  %v2284_v18 = vld [vmem:[%s4398_s1 + $0x58] sm:$0xf]  ;;  %v3058_v19 = vld [vmem:[%s4398_s1 + $0x68] sm:$0xf0]  ;;  %v3056_v20 = vld [vmem:[%s4398_s1 + $0x5c] sm:$0xf] }
   0x6   :  { %244 = vmatpush.bf16.msra.mxu3 %v2309_v12  ;;  %v2285_v21 = vor.u32 %v3058_v19, %v2284_v18  ;;  %v2286_v22 = vld [vmem:[%s4398_s1 + $0x6c] sm:$0xf0]  ;;  %v33_v23 = vld [vmem:[%s4397_s0 + $0x20] sm:$0xff]  ;;  %v34_v24 = vld [vmem:[%s4397_s0 + $0x28] sm:$0xff] }
   0x7   :  { %v2289_v25 = vor.u32 %v3056_v20, %v2286_v22  ;;  %v3308_v26 = vpack.c.bf16 %v34_v24, %v33_v23 }
   0x8   :  { %158 = vmatpush.bf16.msra.mxu0 %v2277_v16 }
   0x9   :  { %12 = vsyncpa [#allocation3], 0  ;;  %187 = vmatpush.bf16.msra.mxu1 %v2281_v17  ;;  %216 = vmatpush.bf16.msra.mxu2 %v2285_v21  ;;  %v35_v27 = vld [vmem:[%s4397_s0 + $0x30] sm:$0xff]  ;;  %v36_v28 = vld [vmem:[%s4397_s0 + $0x38] sm:$0xff]  ;;  %vm838_vm1 = vcmask 523264   ;;  %vm1506_vm2 = vcmask 1045504  }
   0xa   :  { %245 = vmatpush.bf16.msra.mxu3 %v2289_v25  ;;  %v70_v29 = vpack.c.bf16 %v36_v28, %v35_v27  ;;  %v3050_v30 = vld [vmem:[%s4398_s1 + $0x2c] sm:$0xf]  ;;  %v2358_v31 = vld [vmem:[%s4398_s1 + $0x3c] sm:$0xf0]  ;;  %v2312_v32 = vld [vmem:[%s4398_s1 + $0x88] sm:$0xf] }
   0xb   :  { %2314 = vmatmul.msk.bf16.vlgmr.msra.gmra.mxu0 %vm138_vm0, %v3308_v26  ;;  %v2361_v33 = vor.u32 %v3050_v30, %v2358_v31  ;;  %v3064_v34 = vld [vmem:[%s4398_s1 + $0x98] sm:$0xf0]  ;;  %v2356_v35 = vld [vmem:[%s4398_s1 + $0x28] sm:$0xf]  ;;  %v2364_v39 = vld [vmem:[%s4398_s1 + $0x30] sm:$0xf] }
   0xc   :  { %2318 = vmatmul.msk.bf16.vlgmr.msra.gmra.mxu1 %vm138_vm0, %v3308_v26  ;;  %2322 = vmatmul.msk.bf16.vlgmr.msra.gmra.mxu2 %vm138_vm0, %v3308_v26  ;;  %v3052_v36 = vld [vmem:[%s4398_s1 + $0x38] sm:$0xf0]  ;;  %v2313_v37 = vor.u32 %v3064_v34, %v2312_v32  ;;  %v3053_v40 = vld [vmem:[%s4398_s1 + $0x40] sm:$0xf0]  ;;  %v2292_v41 = vld [vmem:[%s4398_s1 + $0x60] sm:$0xf] }
   0xd   :  { %2326 = vmatmul.msk.bf16.vlgmr.msra.gmra.mxu3 %vm138_vm0, %v3308_v26  ;;  %v2357_v38 = vor.u32 %v3052_v36, %v2356_v35  ;;  %395 = vmatpush.bf16.msrb.mxu2 %v2361_v33  ;;  %v2365_v42 = vor.u32 %v3053_v40, %v2364_v39  ;;  %v3059_v43 = vld [vmem:[%s4398_s1 + $0x70] sm:$0xf0]  ;;  %v2336_v44 = vld [vmem:[%s4398_s1] sm:$0xf]  ;;  %v3045_v48 = vld [vmem:[%s4398_s1 + $0x4] sm:$0xf] }
   0xe   :  { %v3047_v45 = vld [vmem:[%s4398_s1 + $0x10] sm:$0xf0]  ;;  %273 = vmatpush.bf16.msrb.mxu0 %v2313_v37  ;;  %v2293_v46 = vor.u32 %v3059_v43, %v2292_v41  ;;  %v2338_v49 = vld [vmem:[%s4398_s1 + $0x14] sm:$0xf0]  ;;  %v2344_v50 = vld [vmem:[%s4398_s1 + $0x8] sm:$0xf] }
   0xf   :  { %366 = vmatpush.bf16.msrb.mxu1 %v2357_v38  ;;  %v2337_v47 = vor.u32 %v3047_v45, %v2336_v44  ;;  %424 = vmatpush.bf16.msrb.mxu3 %v2365_v42  ;;  %v2341_v51 = vor.u32 %v3045_v48, %v2338_v49  ;;  %v3048_v52 = vld [vmem:[%s4398_s1 + $0x18] sm:$0xf0]  ;;  %v45_v54 = vld [vmem:[%s4397_s0 + $0x80] sm:$0xff]  ;;  %v46_v55 = vld [vmem:[%s4397_s0 + $0x88] sm:$0xff]  ;;  %vm1502_vm3 = vcmask 228352   ;;  %s3213_s29 = smov [#allocation2]  }
  0x10   :  { %v2345_v53 = vor.u32 %v3048_v52, %v2344_v50  ;;  %v71_v56 = vpack.c.bf16 %v46_v55, %v45_v54  ;;  %v47_v57 = vld [vmem:[%s4397_s0 + $0x90] sm:$0xff]  ;;  %v48_v58 = vld [vmem:[%s4397_s0 + $0x98] sm:$0xff]  ;;  %v29_v60 = vld [vmem:[%s4397_s0] sm:$0xff]  ;;  %s2253_s9 = sshll.u32 %s4404_s7, 4  ;;  %s2254_s9 = int_to_ptr.hbm [resolvable:$true] %s2253_s9 }
  0x11   :  { %396 = vmatpush.bf16.msrb.mxu2 %v2341_v51  ;;  %v72_v59 = vpack.c.bf16 %v48_v58, %v47_v57  ;;  %v30_v61 = vld [vmem:[%s4397_s0 + $0x8] sm:$0xff]  ;;  %v31_v63 = vld [vmem:[%s4397_s0 + $0x10] sm:$0xff]  ;;  %v32_v0 = vld [vmem:[%s4397_s0 + $0x18] sm:$0xff] }
  0x12   :  { %274 = vmatpush.bf16.msrb.mxu0 %v2293_v46  ;;  %v3402_v62 = vpack.c.bf16 %v30_v61, %v29_v60  ;;  %v3418_v1 = vpack.c.bf16 %v32_v0, %v31_v63  ;;  %v2428_v2 = vld [vmem:[%s4398_s1 + $0xc8] sm:$0xf]  ;;  %v3072_v3 = vld [vmem:[%s4398_s1 + $0xd8] sm:$0xf0]  ;;  %v3051_v4 = vld [vmem:[%s4398_s1 + $0x34] sm:$0xf] }
  0x13   :  { %367 = vmatpush.bf16.msrb.mxu1 %v2337_v47  ;;  %425 = vmatpush.bf16.msrb.mxu3 %v2345_v53  ;;  %v2429_v5 = vor.u32 %v3072_v3, %v2428_v2  ;;  %v2366_v6 = vld [vmem:[%s4398_s1 + $0x44] sm:$0xf0]  ;;  %v2372_v7 = vld [vmem:[%s4398_s1 + $0x38] sm:$0xf]  ;;  %v3054_v8 = vld [vmem:[%s4398_s1 + $0x48] sm:$0xf0] }
  0x14   :  { %v2369_v9 = vor.u32 %v3051_v4, %v2366_v6  ;;  %v2373_v10 = vor.u32 %v3054_v8, %v2372_v7  ;;  %v3070_v11 = vld [vmem:[%s4398_s1 + $0xcc] sm:$0xf]  ;;  %v2430_v12 = vld [vmem:[%s4398_s1 + $0xdc] sm:$0xf0]  ;;  %v2352_v18 = vld [vmem:[%s4398_s1 + $0x10] sm:$0xf] }
  0x15   :  { %592 = vmatpush.bf16.msra.mxu2 %v2429_v5  ;;  %v2433_v13 = vor.u32 %v3070_v11, %v2430_v12  ;;  %v41_v14 = vld [vmem:[%s4397_s0 + $0x60] sm:$0xff]  ;;  %v42_v15 = vld [vmem:[%s4397_s0 + $0x68] sm:$0xff]  ;;  %v3067_v23 = vld [vmem:[%s4398_s1 + $0xb0] sm:$0xf0] }
  0x16   :  { %453 = vmatpush.bf16.msra.mxu0 %v2369_v9  ;;  %v3046_v16 = vld [vmem:[%s4398_s1 + $0xc] sm:$0xf]  ;;  %v2346_v17 = vld [vmem:[%s4398_s1 + $0x1c] sm:$0xf0]  ;;  %v3466_v19 = vpack.c.bf16 %v42_v15, %v41_v14  ;;  %v3049_v21 = vld [vmem:[%s4398_s1 + $0x20] sm:$0xf0] }
  0x17   :  { %482 = vmatpush.bf16.msra.mxu1 %v2373_v10  ;;  %621 = vmatpush.bf16.msra.mxu3 %v2433_v13  ;;  %v2349_v20 = vor.u32 %v3046_v16, %v2346_v17  ;;  %v2408_v22 = vld [vmem:[%s4398_s1 + $0xa0] sm:$0xf]  ;;  %v2353_v24 = vor.u32 %v3049_v21, %v2352_v18  ;;  %v2410_v27 = vld [vmem:[%s4398_s1 + $0xb4] sm:$0xf0]  ;;  %v38_v33 = vld [vmem:[%s4397_s0 + $0x48] sm:$0xff] }
  0x18   :  { %v2409_v25 = vor.u32 %v3067_v23, %v2408_v22  ;;  %v44_v30 = vld [vmem:[%s4397_s0 + $0x78] sm:$0xff]  ;;  %v37_v32 = vld [vmem:[%s4397_s0 + $0x40] sm:$0xff]  ;;  %v39_v41 = vld [vmem:[%s4397_s0 + $0x50] sm:$0xff] }
  0x19   :  { %v3513_v35 = vpack.c.bf16 %v38_v33, %v37_v32  ;;  %v40_v42 = vld [vmem:[%s4397_s0 + $0x58] sm:$0xff]  ;;  %v3074_v49 = vld [vmem:[%s4398_s1 + $0xe8] sm:$0xf0]  ;;  %v2436_v55 = vld [vmem:[%s4398_s1 + $0xd0] sm:$0xf] }
  0x1a   :  { %454 = vmatpush.bf16.msra.mxu0 %v2349_v20  ;;  %593 = vmatpush.bf16.msra.mxu2 %v2409_v25  ;;  %v3545_v46 = vpack.c.bf16 %v40_v42, %v39_v41  ;;  %v2444_v48 = vld [vmem:[%s4398_s1 + $0xd8] sm:$0xf]  ;;  %v3071_v57 = vld [vmem:[%s4398_s1 + $0xd4] sm:$0xf]  ;;  %v49_v61 = vld [vmem:[%s4397_s0 + $0xa0] sm:$0xff] }
  0x1b   :  { %2315 = vmatmul.msk.bf16.gmra.mxu0 %vm138_vm0, %v70_v29  ;;  %483 = vmatpush.bf16.msra.mxu1 %v2353_v24  ;;  %v2445_v50 = vor.u32 %v3074_v49, %v2444_v48  ;;  %v2416_v0 = vld [vmem:[%s4398_s1 + $0xa8] sm:$0xf]  ;;  %v3066_v2 = vld [vmem:[%s4398_s1 + $0xac] sm:$0xf]  ;;  %v2418_v7 = vld [vmem:[%s4398_s1 + $0xbc] sm:$0xf0] }
  0x1c   :  { %2319 = vmatmul.msk.bf16.gmra.mxu1 %vm138_vm0, %v70_v29  ;;  %2323 = vmatmul.msk.bf16.gmra.mxu2 %vm138_vm0, %v70_v29  ;;  %v2424_v8 = vld [vmem:[%s4398_s1 + $0xb0] sm:$0xf]  ;;  %v3069_v9 = vld [vmem:[%s4398_s1 + $0xc0] sm:$0xf0]  ;;  %v2421_v11 = vor.u32 %v3066_v2, %v2418_v7  ;;  %v52_v18 = vld [vmem:[%s4397_s0 + $0xb8] sm:$0xff] }
  0x1d   :  { %2327 = vmatmul.msk.bf16.gmra.mxu3 %vm138_vm0, %v70_v29  ;;  %v2425_v12 = vor.u32 %v3069_v9, %v2424_v8  ;;  %v51_v17 = vld [vmem:[%s4397_s0 + $0xb0] sm:$0xff] }
  0x1e   :  { %v508_v22 = vpack.c.bf16 %v52_v18, %v51_v17 }
  0x2b   :  { %2316 = vmatmul.msk.bf16.gmra.mxu0 %vm138_vm0, %v71_v56 }
  0x2c   :  { %2320 = vmatmul.msk.bf16.gmra.mxu1 %vm138_vm0, %v71_v56  ;;  %2324 = vmatmul.msk.bf16.gmra.mxu2 %vm138_vm0, %v71_v56 }
  0x2d   :  { %2328 = vmatmul.msk.bf16.gmra.mxu3 %vm138_vm0, %v71_v56 }
  0x3b   :  { %2317 = vmatmul.msk.bf16.gmra.mxu0 %vm138_vm0, %v72_v59 }
  0x3c   :  { %2321 = vmatmul.msk.bf16.gmra.mxu1 %vm138_vm0, %v72_v59  ;;  %2325 = vmatmul.msk.bf16.gmra.mxu2 %vm138_vm0, %v72_v59 }
  0x3d   :  { %2329 = vmatmul.msk.bf16.gmra.mxu3 %vm138_vm0, %v72_v59 }
  0x4b   :  { %2330 = vmatmul.msk.bf16.vlgmr.msrb.gmra.mxu0 %vm138_vm0, %v3308_v26  ;;  %v3065_v26 = vld [vmem:[%s4398_s1 + $0xa4] sm:$0xf] }
  0x4c   :  { %2374 = vmatmul.msk.bf16.vlgmr.msrb.gmra.mxu1 %vm138_vm0, %v3402_v62  ;;  %2378 = vmatmul.msk.bf16.vlgmr.msrb.gmra.mxu2 %vm138_vm0, %v3402_v62  ;;  %v2413_v28 = vor.u32 %v3065_v26, %v2410_v27 }
  0x4d   :  { %2382 = vmatmul.msk.bf16.vlgmr.msrb.gmra.mxu3 %vm138_vm0, %v3402_v62  ;;  %708 = vmatpush.bf16.msrb.mxu2 %v2445_v50 }
  0x4e   :  { %622 = vmatpush.bf16.msra.mxu3 %v2413_v28 }
  0x51   :  { %709 = vmatpush.bf16.msrb.mxu2 %v2425_v12 }
  0x5b   :  { %2331 = vmatmul.msk.bf16.gmra.mxu0 %vm138_vm0, %v70_v29  ;;  %v43_v29 = vld [vmem:[%s4397_s0 + $0x70] sm:$0xff] }
  0x5c   :  { %2375 = vmatmul.msk.bf16.gmra.mxu1 %vm138_vm0, %v3418_v1  ;;  %2379 = vmatmul.msk.bf16.gmra.mxu2 %vm138_vm0, %v3418_v1  ;;  %v3496_v31 = vpack.c.bf16 %v44_v30, %v43_v29 }
  0x5d   :  { %2383 = vmatmul.msk.bf16.gmra.mxu3 %vm138_vm0, %v3418_v1 }
  0x6b   :  { %2332 = vmatmul.msk.bf16.gmra.mxu0 %vm138_vm0, %v71_v56  ;;  %v3073_v56 = vld [vmem:[%s4398_s1 + $0xe0] sm:$0xf0] }
  0x6c   :  { %2376 = vmatmul.msk.bf16.gmra.mxu1 %vm138_vm0, %v3466_v19  ;;  %2380 = vmatmul.msk.bf16.gmra.mxu2 %vm138_vm0, %v3466_v19  ;;  %v2437_v58 = vor.u32 %v3073_v56, %v2436_v55 }
  0x6d   :  { %2384 = vmatmul.msk.bf16.gmra.mxu3 %vm138_vm0, %v3466_v19 }
  0x6e   :  { %650 = vmatpush.bf16.msrb.mxu0 %v2437_v58 }
  0x7b   :  { %2333 = vmatmul.msk.bf16.gmra.mxu0 %vm138_vm0, %v72_v59  ;;  %v2438_v59 = vld [vmem:[%s4398_s1 + $0xe4] sm:$0xf0] }
  0x7c   :  { %2377 = vmatmul.msk.bf16.gmra.mxu1 %vm138_vm0, %v3496_v31  ;;  %2381 = vmatmul.msk.bf16.gmra.mxu2 %vm138_vm0, %v3496_v31  ;;  %v2441_v60 = vor.u32 %v3071_v57, %v2438_v59 }
  0x7d   :  { %2385 = vmatmul.msk.bf16.gmra.mxu3 %vm138_vm0, %v3496_v31 }
  0x7e   :  { %679 = vmatpush.bf16.msrb.mxu1 %v2441_v60 }
  0x82   :  { %680 = vmatpush.bf16.msrb.mxu1 %v2421_v11 }
  0x88   :  { %v3511_v34 = vpop.f32.mrf.mxu0 }
  0x89   :  { %v3515_v36 = vpop.f32.mrf.mxu1 }
  0x8b   :  { %2386 = vmatmul.msk.bf16.vlgmr.msra.gmra.mxu0 %vm138_vm0, %v3402_v62 }
  0x8c   :  { %2390 = vmatmul.msk.bf16.vlgmr.msra.gmra.mxu1 %vm138_vm0, %v3402_v62  ;;  %2446 = vmatmul.msk.bf16.vlgmr.msra.gmra.mxu2 %vm138_vm0, %v3513_v35  ;;  %v50_v62 = vld [vmem:[%s4397_s0 + $0xa8] sm:$0xff]  ;;  %s2251_s0 = sshll.u32 %s3213_s29, 4  ;;  %s2252_s0 = int_to_ptr.vmem [resolvable:$true] %s2251_s0 }
  0x8d   :  { %2450 = vmatmul.msk.bf16.vlgmr.msra.gmra.mxu3 %vm138_vm0, %v3513_v35  ;;  %v3604_v5 = vpack.c.bf16 %v50_v62, %v49_v61 }
  0x8f   :  { %v3525_v37 = vpop.f32.mrf.mxu2 }
  0x90   :  { %v3527_v38 = vpop.f32.mrf.mxu3  ;;  %v3529_v39 = vpop.f32.mrf.mxu0 }
  0x91   :  { %v3531_v40 = vpop.f32.mrf.mxu1 }
  0x97   :  { %v3539_v43 = vpop.f32.mrf.mxu2 }
  0x98   :  { %v3541_v44 = vpop.f32.mrf.mxu3  ;;  %v3543_v45 = vpop.f32.mrf.mxu0 }
  0x99   :  { %v3547_v47 = vpop.f32.mrf.mxu1 }
  0x9b   :  { %2387 = vmatmul.msk.bf16.gmra.mxu0 %vm138_vm0, %v3418_v1 }
  0x9c   :  { %2391 = vmatmul.msk.bf16.gmra.mxu1 %vm138_vm0, %v3418_v1  ;;  %2447 = vmatmul.msk.bf16.gmra.mxu2 %vm138_vm0, %v3545_v46  ;;  %v3068_v1 = vld [vmem:[%s4398_s1 + $0xb8] sm:$0xf0] }
  0x9d   :  { %2451 = vmatmul.msk.bf16.gmra.mxu3 %vm138_vm0, %v3545_v46  ;;  %v2417_v6 = vor.u32 %v3068_v1, %v2416_v0 }
  0x9f   :  { %v3563_v51 = vpop.f32.mrf.mxu2  ;;  %651 = vmatpush.bf16.msrb.mxu0 %v2417_v6 }
  0xa0   :  { %v3565_v52 = vpop.f32.mrf.mxu3  ;;  %v3567_v53 = vpop.f32.mrf.mxu0 }
  0xa1   :  { %v3569_v54 = vpop.f32.mrf.mxu1 }
  0xa7   :  { %v3589_v63 = vpop.f32.mrf.mxu2 }
  0xa8   :  { %v3600_v3 = vpop.f32.mrf.mxu3  ;;  %v3602_v4 = vpop.f32.mrf.mxu0 }
  0xa9   :  { %v3615_v10 = vpop.f32.mrf.mxu1 }
  0xab   :  { %2388 = vmatmul.msk.bf16.gmra.mxu0 %vm138_vm0, %v3466_v19 }
  0xac   :  { %2392 = vmatmul.msk.bf16.gmra.mxu1 %vm138_vm0, %v3466_v19  ;;  %2448 = vmatmul.msk.bf16.gmra.mxu2 %vm138_vm0, %v3604_v5 }
  0xad   :  { %2452 = vmatmul.msk.bf16.gmra.mxu3 %vm138_vm0, %v3604_v5 }
  0xaf   :  { %v228_v13 = vpop.f32.mrf.mxu2 }
  0xb0   :  { %v3625_v14 = vpop.f32.mrf.mxu3  ;;  %v3627_v15 = vpop.f32.mrf.mxu0 }
  0xb1   :  { %v3629_v16 = vpop.f32.mrf.mxu1 }
  0xb7   :  { %v3637_v19 = vpop.f32.mrf.mxu2 }
  0xb8   :  { %v3639_v20 = vpop.f32.mrf.mxu3  ;;  %v175_v21 = vpop.f32.mrf.mxu0 }
  0xb9   :  { %v204_v23 = vpop.f32.mrf.mxu1 }
  0xbb   :  { %2389 = vmatmul.msk.bf16.gmra.mxu0 %vm138_vm0, %v3496_v31 }
  0xbc   :  { %2393 = vmatmul.msk.bf16.gmra.mxu1 %vm138_vm0, %v3496_v31  ;;  %2449 = vmatmul.msk.bf16.gmra.mxu2 %vm138_vm0, %v508_v22 }
  0xbd   :  { %2453 = vmatmul.msk.bf16.gmra.mxu3 %vm138_vm0, %v508_v22 }
  0xbf   :  { %v233_v24 = vpop.f32.mrf.mxu2 }
  0xc0   :  { %v3647_v25 = vpop.f32.mrf.mxu3  ;;  %v3649_v26 = vpop.f32.mrf.mxu0 }
  0xc1   :  { %v3651_v27 = vpop.f32.mrf.mxu1 }
  0xc7   :  { %v3653_v28 = vpop.f32.mrf.mxu2 }
  0xc8   :  { %v3655_v29 = vpop.f32.mrf.mxu3  ;;  %v276_v30 = vpop.f32.mrf.mxu0 }
  0xc9   :  { %4405 = vst [vmem:[#allocation5_spill] sm:$0xff] %v3655_v29  ;;  %v369_v32 = vpop.f32.mrf.mxu1 }
  0xca   :  { %v370_v33 = vadd.f32 %v369_v32, %v3511_v34 }
  0xcb   :  { %2454 = vmatmul.msk.bf16.vlgmr.msrb.gmra.mxu0 %vm138_vm0, %v3513_v35 }
  0xcc   :  { %2458 = vmatmul.msk.bf16.vlgmr.msrb.gmra.mxu1 %vm138_vm0, %v3513_v35  ;;  %2462 = vmatmul.msk.bf16.vlgmr.msrb.gmra.mxu2 %vm138_vm0, %v3513_v35 }
  0xcf   :  { %v398_v31 = vpop.f32.mrf.mxu2 }
  0xd0   :  { %v399_v41 = vadd.f32 %v398_v31, %v3515_v36  ;;  %v427_v42 = vpop.f32.mrf.mxu3  ;;  %v3665_v48 = vpop.f32.mrf.mxu0 }
  0xd1   :  { %4406 = vst [vmem:[#allocation6_spill] sm:$0xff] %v3665_v48  ;;  %v3668_v49 = vadd.f32 %v427_v42, %v3525_v37  ;;  %v371_v50 = vpop.f32.mrf.mxu1 }
  0xd7   :  { %v400_v34 = vpop.f32.mrf.mxu2 }
  0xd8   :  { %v3670_v55 = vpop.f32.mrf.mxu3  ;;  %v281_v56 = vpop.f32.mrf.mxu0 }
  0xd9   :  { %v374_v57 = vpop.f32.mrf.mxu1 }
  0xda   :  { %v3673_v58 = vadd.f32 %v374_v57, %v3543_v45 }
  0xdb   :  { %2455 = vmatmul.msk.bf16.gmra.mxu0 %vm138_vm0, %v3545_v46 }
  0xdc   :  { %2459 = vmatmul.msk.bf16.gmra.mxu1 %vm138_vm0, %v3545_v46  ;;  %2463 = vmatmul.msk.bf16.gmra.mxu2 %vm138_vm0, %v3545_v46 }
  0xdf   :  { %v403_v35 = vpop.f32.mrf.mxu2 }
  0xe0   :  { %v3682_v36 = vadd.f32 %v403_v35, %v3547_v47  ;;  %v432_v37 = vpop.f32.mrf.mxu3  ;;  %v3684_v59 = vpop.f32.mrf.mxu0 }
  0xe1   :  { %4407 = vst [vmem:[#allocation7_spill] sm:$0xff] %v3684_v59  ;;  %v3687_v60 = vadd.f32 %v432_v37, %v3563_v51  ;;  %v3689_v45 = vpop.f32.mrf.mxu1 }
  0xe7   :  { %v3691_v61 = vpop.f32.mrf.mxu2 }
  0xe8   :  { %v3693_v62 = vpop.f32.mrf.mxu3  ;;  %v3695_v0 = vpop.f32.mrf.mxu0 }
  0xe9   :  { %v379_v1 = vpop.f32.mrf.mxu1 }
  0xea   :  { %v3698_v46 = vadd.f32 %v379_v1, %v3602_v4 }
  0xeb   :  { %2456 = vmatmul.msk.bf16.gmra.mxu0 %vm138_vm0, %v3604_v5 }
  0xec   :  { %2460 = vmatmul.msk.bf16.gmra.mxu1 %vm138_vm0, %v3604_v5  ;;  %2464 = vmatmul.msk.bf16.gmra.mxu2 %vm138_vm0, %v3604_v5 }
  0xef   :  { %v408_v47 = vpop.f32.mrf.mxu2 }
  0xf0   :  { %v3707_v51 = vadd.f32 %v408_v47, %v3615_v10  ;;  %v437_v2 = vpop.f32.mrf.mxu3  ;;  %v3709_v6 = vpop.f32.mrf.mxu0 }
  0xf1   :  { %4408 = vst [vmem:[#allocation8_spill] sm:$0xff] %v3709_v6  ;;  %v3711_v7 = vadd.f32 %v437_v2, %v228_v13  ;;  %v3713_v4 = vpop.f32.mrf.mxu1 }
  0xf7   :  { %v3715_v8 = vpop.f32.mrf.mxu2 }
  0xf8   :  { %v3717_v9 = vpop.f32.mrf.mxu3  ;;  %v3719_v11 = vpop.f32.mrf.mxu0 }
  0xf9   :  { %v384_v12 = vpop.f32.mrf.mxu1 }
  0xfa   :  { %v3721_v17 = vadd.f32 %v384_v12, %v175_v21 }
  0xfb   :  { %2457 = vmatmul.msk.bf16.gmra.mxu0 %vm138_vm0, %v508_v22 }
  0xfc   :  { %2461 = vmatmul.msk.bf16.gmra.mxu1 %vm138_vm0, %v508_v22  ;;  %2465 = vmatmul.msk.bf16.gmra.mxu2 %vm138_vm0, %v508_v22 }
  0xff   :  { %v413_v5 = vpop.f32.mrf.mxu2 }
 0x100   :  { %v3726_v10 = vadd.f32 %v413_v5, %v204_v23  ;;  %v442_v13 = vpop.f32.mrf.mxu3  ;;  %v3728_v18 = vpop.f32.mrf.mxu0  ;;  %v372_v5 = vadd.f32 %v371_v50, %v3529_v39 }
 0x101   :  { %4409 = vst [vmem:[#allocation9_spill] sm:$0xff] %v3728_v18  ;;  %v3730_v32 = vadd.f32 %v442_v13, %v233_v24  ;;  %v3732_v31 = vpop.f32.mrf.mxu1  ;;  %v401_v13 = vadd.f32 %v400_v34, %v3531_v40 }
 0x107   :  { %v3734_v42 = vpop.f32.mrf.mxu2 }
 0x108   :  { %v3736_v21 = vpop.f32.mrf.mxu3  ;;  %v3738_v57 = vpop.f32.mrf.mxu0 }
 0x109   :  { %4410 = vst [vmem:[#allocation10_spill] sm:$0xff] %v3736_v21  ;;  %v485_v35 = vpop.f32.mrf.mxu1 }
 0x10a   :  { %v3740_v37 = vadd.f32 %v485_v35, %v276_v30 }
 0x10f   :  { %v595_v22 = vpop.f32.mrf.mxu2 }
 0x110   :  { %v731_v1 = vadd.f32 %v595_v22, %v370_v33  ;;  %v624_v23 = vpop.f32.mrf.mxu3  ;;  %v3742_v47 = vpop.f32.mrf.mxu0 }
 0x111   :  { %v732_v2 = vadd.f32 %v624_v23, %v399_v41  ;;  %v3744_v12 = vpop.f32.mrf.mxu1 }
 0x112   :  { %4411 = vst [vmem:[#allocation11_spill] sm:$0xff] %v3744_v12 }
 0x113   :  { %v771_v24 = vpack.c.bf16 %v732_v2, %v731_v1  ;;  %v406_v2 = vadd.f32 %v3691_v61, %v3569_v54 }
 0x115   :  { %v822_v22 = vunpack.c.h.b16 %v771_v24  ;;  %v874_v21 = vunpack.c.l.b16 %v771_v24 }
 0x117   :  { %v597_v48 = vpop.f32.mrf.mxu2 }
 0x118   :  { %v736_v59 = vadd.f32 %v597_v48, %v372_v5  ;;  %v626_v18 = vpop.f32.mrf.mxu3  ;;  %v3748_v6 = vpop.f32.mrf.mxu0 }
 0x119   :  { %v737_v30 = vadd.f32 %v626_v18, %v401_v13  ;;  %v490_v35 = vpop.f32.mrf.mxu1 }
 0x11a   :  { %v3750_v29 = vadd.f32 %v490_v35, %v281_v56 }
 0x11b   :  { %v774_v33 = vpack.c.bf16 %v737_v30, %v736_v59  ;;  %v377_v59 = vadd.f32 %v3689_v45, %v3567_v53 }
 0x11d   :  { %v823_v41 = vunpack.c.h.b16 %v774_v33  ;;  %v875_v23 = vunpack.c.l.b16 %v774_v33 }
 0x11f   :  { %v600_v12 = vpop.f32.mrf.mxu2  ;;  %v3752_v1 = vpack.c.b16 %v823_v41, %v822_v22  ;;  %v3754_v39 = vpack.c.b16 %v875_v23, %v874_v21 }
 0x120   :  { %v741_v40 = vadd.f32 %v600_v12, %v3673_v58  ;;  %v629_v48 = vpop.f32.mrf.mxu3  ;;  %v3757_v50 = vpop.f32.mrf.mxu0 }
 0x121   :  { %v742_v34 = vadd.f32 %v629_v48, %v3682_v36  ;;  %v3760_v18 = vpop.f32.mrf.mxu1 }
 0x123   :  { %v777_v56 = vpack.c.bf16 %v742_v34, %v741_v40 }
 0x125   :  { %v824_v35 = vunpack.c.h.b16 %v777_v56  ;;  %v876_v33 = vunpack.c.l.b16 %v777_v56  ;;  %v382_v56 = vadd.f32 %v3713_v4, %v3627_v15 }
 0x127   :  { %v602_v24 = vpop.f32.mrf.mxu2 }
 0x128   :  { %v746_v5 = vadd.f32 %v602_v24, %v377_v59  ;;  %v631_v21 = vpop.f32.mrf.mxu3  ;;  %v3766_v13 = vpop.f32.mrf.mxu0  ;;  %v411_v59 = vadd.f32 %v3715_v8, %v3629_v16 }
 0x129   :  { %v747_v58 = vadd.f32 %v631_v21, %v406_v2  ;;  %v495_v12 = vpop.f32.mrf.mxu1 }
 0x12a   :  { %v3769_v30 = vadd.f32 %v495_v12, %v3695_v0 }
 0x12b   :  { %v780_v36 = vpack.c.bf16 %v747_v58, %v746_v5 }
 0x12d   :  { %v825_v22 = vunpack.c.h.b16 %v780_v36  ;;  %v877_v41 = vunpack.c.l.b16 %v780_v36 }
 0x12f   :  { %v605_v23 = vpop.f32.mrf.mxu2  ;;  %v3771_v53 = vpack.c.b16 %v825_v22, %v824_v35  ;;  %v3773_v45 = vpack.c.b16 %v877_v41, %v876_v33 }
 0x130   :  { %v751_v54 = vadd.f32 %v605_v23, %v3698_v46  ;;  %v634_v61 = vpop.f32.mrf.mxu3  ;;  %v3776_v40 = vpop.f32.mrf.mxu0 }
 0x131   :  { %v752_v48 = vadd.f32 %v634_v61, %v3707_v51  ;;  %v3779_v34 = vpop.f32.mrf.mxu1 }
 0x133   :  { %v783_v0 = vpack.c.bf16 %v752_v48, %v751_v54  ;;  %v387_v48 = vadd.f32 %v3732_v31, %v3649_v26 }
 0x135   :  { %v826_v36 = vunpack.c.h.b16 %v783_v0  ;;  %v878_v35 = vunpack.c.l.b16 %v783_v0  ;;  %v416_v0 = vadd.f32 %v3734_v42, %v3651_v27  ;;  %v430_v27 = vadd.f32 %v3670_v55, %v3539_v43 }
 0x137   :  { %v607_v2 = vpop.f32.mrf.mxu2 }
 0x138   :  { %v756_v24 = vadd.f32 %v607_v2, %v382_v56  ;;  %v636_v5 = vpop.f32.mrf.mxu3  ;;  %v3785_v21 = vpop.f32.mrf.mxu0 }
 0x139   :  { %v757_v46 = vadd.f32 %v636_v5, %v411_v59  ;;  %v500_v58 = vpop.f32.mrf.mxu1  ;;  %v457_v59 = vadd.f32 %v3738_v57, %v3527_v38  ;;  %v459_v57 = vadd.f32 %v3742_v47, %v3541_v44 }
 0x13a   :  { %v3788_v12 = vadd.f32 %v500_v58, %v3719_v11 }
 0x13b   :  { %v786_v51 = vpack.c.bf16 %v757_v46, %v756_v24 }
 0x13d   :  { %v827_v33 = vunpack.c.h.b16 %v786_v51  ;;  %v879_v22 = vunpack.c.l.b16 %v786_v51 }
 0x13f   :  { %v610_v41 = vpop.f32.mrf.mxu2  ;;  %v832_v15 = vpack.c.b16 %v827_v33, %v826_v36  ;;  %v3790_v4 = vpack.c.b16 %v879_v22, %v878_v35 }
 0x140   :  { %v761_v16 = vadd.f32 %v610_v41, %v3721_v17  ;;  %v639_v8 = vpop.f32.mrf.mxu3  ;;  %v3793_v23 = vpop.f32.mrf.mxu0 }
 0x141   :  { %v762_v54 = vadd.f32 %v639_v8, %v3726_v10  ;;  %v3796_v61 = vpop.f32.mrf.mxu1 }
 0x143   :  { %v789_v11 = vpack.c.bf16 %v762_v54, %v761_v16 }
 0x145   :  { %v828_v35 = vunpack.c.h.b16 %v789_v11  ;;  %v880_v33 = vunpack.c.l.b16 %v789_v11 }
 0x147   :  { %v612_v56 = vpop.f32.mrf.mxu2 }
 0x148   :  { %v766_v2 = vadd.f32 %v612_v56, %v387_v48  ;;  %v641_v17 = vpop.f32.mrf.mxu3  ;;  %v653_v24 = vpop.f32.mrf.mxu0 }
 0x149   :  { %v767_v5 = vadd.f32 %v641_v17, %v416_v0  ;;  %v733_v46 = vadd.f32 %v653_v24, %v3668_v49  ;;  %v682_v10 = vpop.f32.mrf.mxu1 }
 0x14a   :  { %v734_v58 = vadd.f32 %v682_v10, %v457_v59  ;;  %v462_v59 = vadd.f32 %v3748_v6, %v3565_v52  ;;  %v435_v52 = vadd.f32 %v3693_v62, %v3589_v63  ;;  %v467_v62 = vadd.f32 %v3766_v13, %v3625_v14 }
 0x14b   :  { %v792_v51 = vpack.c.bf16 %v767_v5, %v766_v2  ;;  %v3077_v5 = vld [vmem:[%s4399_s2 + $0x10] sm:$0xff] }
 0x14c   :  { %v772_v36 = vpack.c.bf16 %v734_v58, %v733_v46 }
 0x14d   :  { %v829_v26 = vunpack.c.h.b16 %v792_v51  ;;  %v881_v31 = vunpack.c.l.b16 %v792_v51 }
 0x14e   :  { %v938_v48 = vunpack.c.l.b16 %v772_v36  ;;  %v998_v0 = vunpack.c.h.b16 %v772_v36 }
 0x14f   :  { %v833_v42 = vpack.c.b16 %v829_v26, %v828_v35  ;;  %v885_v22 = vpack.c.b16 %v881_v31, %v880_v33  ;;  %v711_v38 = vpop.f32.mrf.mxu2 }
 0x150   :  { %v3810_v41 = vadd.f32 %v711_v38, %v3740_v37  ;;  %v655_v49 = vpop.f32.mrf.mxu0 }
 0x151   :  { %849 = vmatpush.bf16.msrb.mxu3 %v833_v42  ;;  %v738_v16 = vadd.f32 %v655_v49, %v430_v27  ;;  %v684_v8 = vpop.f32.mrf.mxu1 }
 0x152   :  { %v739_v54 = vadd.f32 %v684_v8, %v459_v57 }
 0x154   :  { %v775_v11 = vpack.c.bf16 %v739_v54, %v738_v16 }
 0x155   :  { %850 = vmatpush.bf16.msrb.mxu3 %v832_v15 }
 0x156   :  { %v939_v56 = vunpack.c.l.b16 %v775_v11  ;;  %v999_v43 = vunpack.c.h.b16 %v775_v11 }
 0x157   :  { %v3812_v55 = vpop.f32.mrf.mxu2 }
 0x158   :  { %v658_v44 = vpop.f32.mrf.mxu0  ;;  %v3816_v47 = vpack.c.b16 %v939_v56, %v938_v48  ;;  %v3818_v37 = vpack.c.b16 %v999_v43, %v998_v0  ;;  %v472_v43 = vadd.f32 %v3785_v21, %v3647_v25 }
 0x159   :  { %851 = vmatpush.bf16.msrb.mxu3 %v3771_v53  ;;  %v743_v2 = vadd.f32 %v658_v44, %v3687_v60  ;;  %v687_v17 = vpop.f32.mrf.mxu1  ;;  %v464_v53 = vadd.f32 %v3757_v50, %v3600_v3 }
 0x15a   :  { %v744_v15 = vadd.f32 %v687_v17, %v462_v59  ;;  %v3075_v17 = vld [vmem:[%s4399_s2] sm:$0xff] }
 0x15c   :  { %v778_v24 = vpack.c.bf16 %v744_v15, %v743_v2  ;;  %v4412_v15 = vld [vmem:[#allocation10_spill] sm:$0xff] }
 0x15d   :  { %852 = vmatpush.bf16.msrb.mxu3 %v3752_v1 }
 0x15e   :  { %v940_v1 = vunpack.c.l.b16 %v778_v24  ;;  %v1000_v36 = vunpack.c.h.b16 %v778_v24  ;;  %v445_v24 = vadd.f32 %v4412_v15, %v3653_v28 }
 0x15f   :  { %v3828_v6 = vpop.f32.mrf.mxu2 }
 0x160   :  { %v660_v60 = vpop.f32.mrf.mxu0  ;;  %2478 = vmatmul.msk.bf16.vlgmr.msrb.gmra.mxu3 %vm838_vm1, %v3077_v5 }
 0x161   :  { %900 = vmatpush.bf16.msra.mxu3 %v885_v22  ;;  %v748_v46 = vadd.f32 %v660_v60, %v435_v52  ;;  %v689_v10 = vpop.f32.mrf.mxu1  ;;  %v440_v22 = vadd.f32 %v3717_v9, %v3637_v19  ;;  %v4413_v52 = vld [vmem:[#allocation5_spill] sm:$0xff] }
 0x162   :  { %v749_v58 = vadd.f32 %v689_v10, %v464_v53  ;;  %v474_v53 = vadd.f32 %v3793_v23, %v4413_v52 }
 0x164   :  { %v781_v51 = vpack.c.bf16 %v749_v58, %v748_v46  ;;  %v4414_v46 = vld [vmem:[#allocation8_spill] sm:$0xff] }
 0x165   :  { %901 = vmatpush.bf16.msra.mxu3 %v3790_v4  ;;  %v2476_v4 = vld [vmem:[%s4399_s2 + $0x18] sm:$0xf]  ;;  %v498_v10 = vadd.f32 %v3779_v34, %v4414_v46  ;;  %v2682_v46 = vld [vmem:[%s4400_s3 + $0x120] sm:$0xf] }
 0x166   :  { %v941_v35 = vunpack.c.l.b16 %v781_v51  ;;  %v1001_v33 = vunpack.c.h.b16 %v781_v51 }
 0x167   :  { %v718_v63 = vpop.f32.mrf.mxu2 }
 0x168   :  { %v663_v3 = vpop.f32.mrf.mxu0  ;;  %v3837_v50 = vpack.c.b16 %v941_v35, %v940_v1  ;;  %v3839_v26 = vpack.c.b16 %v1001_v33, %v1000_v36  ;;  %v4415_v1 = vld [vmem:[#allocation9_spill] sm:$0xff] }
 0x169   :  { %902 = vmatpush.bf16.msra.mxu3 %v3773_v45  ;;  %v753_v31 = vadd.f32 %v663_v3, %v3711_v7  ;;  %v692_v27 = vpop.f32.mrf.mxu1  ;;  %v3078_v45 = vld [vmem:[%s4399_s2 + $0x18] sm:$0x30]  ;;  %v469_v7 = vadd.f32 %v3776_v40, %v3639_v20  ;;  %v503_v36 = vadd.f32 %v3796_v61, %v4415_v1  ;;  %v4416_v3 = vld [vmem:[#allocation7_spill] sm:$0xff]  ;;  %v3076_v61 = vld [vmem:[%s4399_s2 + $0x8] sm:$0x30] }
 0x16a   :  { %v754_v42 = vadd.f32 %v692_v27, %v467_v62  ;;  %v2477_v13 = vor.u32 %v3078_v45, %v2476_v4  ;;  %v3121_v1 = vld [vmem:[%s4400_s3 + $0x124] sm:$0xf] }
 0x16c   :  { %v784_v14 = vpack.c.bf16 %v754_v42, %v753_v31  ;;  %v493_v31 = vadd.f32 %v3760_v18, %v4416_v3  ;;  %v4417_v18 = vld [vmem:[#allocation6_spill] sm:$0xff] }
 0x16d   :  { %903 = vmatpush.bf16.msra.mxu3 %v3754_v39  ;;  %v2656_v3 = vld [vmem:[%s4400_s3 + $0x104] sm:$0xf0] }
 0x16e   :  { %v942_v11 = vunpack.c.l.b16 %v784_v14  ;;  %v1002_v48 = vunpack.c.h.b16 %v784_v14 }
 0x16f   :  { %v721_v38 = vpop.f32.mrf.mxu2 }
 0x170   :  { %v665_v57 = vpop.f32.mrf.mxu0  ;;  %2479 = vmatmul.msk.bf16.gmra.mxu3 %vm838_vm1, %v2477_v13  ;;  %v755_v27 = vadd.f32 %v721_v38, %v3769_v30  ;;  %v750_v13 = vadd.f32 %v718_v63, %v493_v31  ;;  %v4418_v30 = vld [vmem:[#allocation11_spill] sm:$0xff] }
 0x171   :  { %v758_v49 = vadd.f32 %v665_v57, %v440_v22  ;;  %v694_v16 = vpop.f32.mrf.mxu1  ;;  %v488_v38 = vadd.f32 %v4418_v30, %v4417_v18  ;;  %v745_v57 = vadd.f32 %v3828_v6, %v3750_v29  ;;  %v773_v29 = vpack.c.bf16 %v3810_v41, %v3810_v41  ;;  %v3079_v6 = vld [vmem:[%s4399_s2 + $0x20] sm:$0xff]  ;;  %v2662_v31 = vld [vmem:[%s4400_s3 + $0xf8] sm:$0xf]  ;;  %v2642_v30 = vld [vmem:[%s4400_s3 + $0xd0] sm:$0xf] }
 0x172   :  { %v759_v8 = vadd.f32 %v694_v16, %v469_v7 }
 0x173   :  { %v779_v63 = vpack.c.bf16 %v745_v57, %v745_v57  ;;  %v3111_v57 = vld [vmem:[%s4400_s3 + $0xd4] sm:$0xf] }
 0x174   :  { %v787_v54 = vpack.c.bf16 %v759_v8, %v758_v49  ;;  %v785_v49 = vpack.c.bf16 %v755_v27, %v755_v27  ;;  %v3118_v27 = vld [vmem:[%s4400_s3 + $0x108] sm:$0xf0] }
 0x176   :  { %v943_v0 = vunpack.c.l.b16 %v787_v54  ;;  %v1003_v39 = vunpack.c.h.b16 %v787_v54 }
 0x177   :  { %v723_v56 = vpop.f32.mrf.mxu2 }
 0x178   :  { %v668_v19 = vpop.f32.mrf.mxu0  ;;  %v948_v9 = vpack.c.b16 %v943_v0, %v942_v11  ;;  %v1008_v59 = vpack.c.b16 %v1003_v39, %v1002_v48  ;;  %v760_v28 = vadd.f32 %v723_v56, %v498_v10  ;;  %v740_v11 = vadd.f32 %v3812_v55, %v488_v38  ;;  %v3123_v10 = vld [vmem:[%s4400_s3 + $0x130] sm:$0xf0]  ;;  %v3113_v38 = vld [vmem:[%s4400_s3 + $0xe0] sm:$0xf0] }
 0x179   :  { %v763_v20 = vadd.f32 %v668_v19, %v3730_v32  ;;  %v697_v40 = vpop.f32.mrf.mxu1  ;;  %v782_v48 = vpack.c.bf16 %v750_v13, %v750_v13  ;;  %v1070_v56 = vunpack.c.l.b16 %v785_v49  ;;  %v1068_v55 = vunpack.c.l.b16 %v779_v63  ;;  %v3110_v13 = vld [vmem:[%s4400_s3 + $0xcc] sm:$0xf] }
 0x17a   :  { %v764_v44 = vadd.f32 %v697_v40, %v472_v43  ;;  %v788_v22 = vpack.c.bf16 %v760_v28, %v760_v28  ;;  %v776_v43 = vpack.c.bf16 %v740_v11, %v740_v11  ;;  %v2643_v49 = vor.u32 %v3113_v38, %v2642_v30  ;;  %v3088_v30 = vld [vmem:[%s4400_s3 + $0x18] sm:$0xf0] }
 0x17b   :  { %v1069_v19 = vunpack.c.l.b16 %v782_v48  ;;  %v2614_v48 = vld [vmem:[%s4400_s3 + $0xa0] sm:$0xf] }
 0x17c   :  { %v790_v2 = vpack.c.bf16 %v764_v44, %v763_v20  ;;  %v1071_v0 = vunpack.c.l.b16 %v788_v22  ;;  %v2514_v44 = vld [vmem:[%s4399_s2 + $0x38] sm:$0xf]  ;;  %v2636_v22 = vld [vmem:[%s4400_s3 + $0xdc] sm:$0xf0] }
 0x17d   :  { %v1075_v40 = vpack.c.b16 %v1069_v19, %v1068_v55  ;;  %v2639_v18 = vor.u32 %v3110_v13, %v2636_v22  ;;  %v3108_v19 = vld [vmem:[%s4400_s3 + $0xb8] sm:$0xf0]  ;;  %v3106_v55 = vld [vmem:[%s4400_s3 + $0xac] sm:$0xf]  ;;  %v3085_v13 = vld [vmem:[%s4400_s3 + $0x4] sm:$0xf] }
 0x17e   :  { %v944_v35 = vunpack.c.l.b16 %v790_v2  ;;  %v1004_v33 = vunpack.c.h.b16 %v790_v2  ;;  %v1076_v20 = vpack.c.b16 %v1071_v0, %v1070_v56  ;;  %v3082_v2 = vld [vmem:[%s4399_s2 + $0x38] sm:$0x30]  ;;  %v3107_v0 = vld [vmem:[%s4400_s3 + $0xb0] sm:$0xf0]  ;;  %v2616_v56 = vld [vmem:[%s4400_s3 + $0xb4] sm:$0xf0] }
 0x17f   :  { %v726_v5 = vpop.f32.mrf.mxu2  ;;  %v2515_v15 = vor.u32 %v3082_v2, %v2514_v44  ;;  %v2615_v63 = vor.u32 %v3107_v0, %v2614_v48  ;;  %v3103_v44 = vld [vmem:[%s4400_s3 + $0x90] sm:$0xf0]  ;;  %v2690_v48 = vld [vmem:[%s4400_s3 + $0x128] sm:$0xf]  ;;  %v3124_v0 = vld [vmem:[%s4400_s3 + $0x138] sm:$0xf0] }
 0x180   :  { %v670_v25 = vpop.f32.mrf.mxu0  ;;  %2488 = vmatmul.msk.bf16.vlgmr.msra.gmra.mxu3 %vm838_vm1, %v3075_v17  ;;  %v765_v58 = vadd.f32 %v726_v5, %v3788_v12  ;;  %v2486_v12 = vld [vmem:[%s4399_s2 + $0x8] sm:$0xf]  ;;  %v3084_v5 = vld [vmem:[%s4399_s2 + $0x48] sm:$0x30] }
 0x181   :  { %v768_v21 = vadd.f32 %v670_v25, %v445_v24  ;;  %v699_v60 = vpop.f32.mrf.mxu1  ;;  %v2487_v54 = vor.u32 %v3076_v61, %v2486_v12  ;;  %v2528_v24 = vld [vmem:[%s4399_s2 + $0x48] sm:$0xf]  ;;  %v3122_v25 = vld [vmem:[%s4400_s3 + $0x128] sm:$0xf0]  ;;  %v3112_v61 = vld [vmem:[%s4400_s3 + $0xd8] sm:$0xf0] }
 0x182   :  { %v769_v32 = vadd.f32 %v699_v60, %v474_v53  ;;  %v791_v45 = vpack.c.bf16 %v765_v58, %v765_v58  ;;  %v2529_v52 = vor.u32 %v3084_v5, %v2528_v24  ;;  %v2674_v53 = vld [vmem:[%s4400_s3 + $0x118] sm:$0xf] }
 0x183   :  { %v2675_v60 = vor.u32 %v3122_v25, %v2674_v53  ;;  %v2604_v24 = vld [vmem:[%s4400_s3 + $0x94] sm:$0xf0]  ;;  %v3097_v53 = vld [vmem:[%s4400_s3 + $0x60] sm:$0xf0]  ;;  %v3095_v25 = vld [vmem:[%s4400_s3 + $0x54] sm:$0xf] }
 0x184   :  { %v793_v51 = vpack.c.bf16 %v769_v32, %v768_v21  ;;  %v1072_v16 = vunpack.c.l.b16 %v791_v45  ;;  %v3120_v21 = vld [vmem:[%s4400_s3 + $0x11c] sm:$0xf]  ;;  %v2676_v32 = vld [vmem:[%s4400_s3 + $0x12c] sm:$0xf0]  ;;  %v2663_v45 = vor.u32 %v3118_v27, %v2662_v31  ;;  %v3093_v27 = vld [vmem:[%s4400_s3 + $0x40] sm:$0xf0] }
 0x185   :  { %v2679_v58 = vor.u32 %v3120_v21, %v2676_v32  ;;  %1374 = vmatpush.bf16.msrb.mxu3 %v2675_v60  ;;  %v2576_v60 = vld [vmem:[%s4400_s3 + $0x64] sm:$0xf0]  ;;  %v2582_v32 = vld [vmem:[%s4400_s3 + $0x58] sm:$0xf]  ;;  %v2562_v31 = vld [vmem:[%s4400_s3 + $0x30] sm:$0xf] }
 0x186   :  { %v945_v62 = vunpack.c.l.b16 %v793_v51  ;;  %v1005_v23 = vunpack.c.h.b16 %v793_v51  ;;  %v2683_v51 = vor.u32 %v3123_v10, %v2682_v46  ;;  %v3098_v46 = vld [vmem:[%s4400_s3 + $0x68] sm:$0xf0]  ;;  %v2579_v10 = vor.u32 %v3095_v25, %v2576_v60 }
 0x187   :  { %v728_v4 = vpop.f32.mrf.mxu2  ;;  %v3094_v60 = vld [vmem:[%s4400_s3 + $0x48] sm:$0xf0] }
 0x188   :  { %v949_v42 = vpack.c.b16 %v945_v62, %v944_v35  ;;  %v1009_v34 = vpack.c.b16 %v1005_v23, %v1004_v33  ;;  %v770_v14 = vadd.f32 %v728_v4, %v503_v36  ;;  %v2684_v36 = vld [vmem:[%s4400_s3 + $0x134] sm:$0xf0]  ;;  %v2654_v35 = vld [vmem:[%s4400_s3 + $0xf0] sm:$0xf]  ;;  %v3117_v33 = vld [vmem:[%s4400_s3 + $0x100] sm:$0xf0] }
 0x189   :  { %v2687_v28 = vor.u32 %v3121_v1, %v2684_v36  ;;  %v3115_v62 = vld [vmem:[%s4400_s3 + $0xf4] sm:$0xf]  ;;  %v2655_v23 = vor.u32 %v3117_v33, %v2654_v35  ;;  %v2584_v1 = vld [vmem:[%s4400_s3 + $0x6c] sm:$0xf0]  ;;  %v2554_v35 = vld [vmem:[%s4400_s3 + $0x28] sm:$0xf] }
 0x18a   :  { %v794_v7 = vpack.c.bf16 %v770_v14, %v770_v14  ;;  %964 = vmatpush.bf16.msra.mxu0 %v949_v42  ;;  %1024 = vmatpush.bf16.msra.mxu1 %v1009_v34  ;;  %v2659_v4 = vor.u32 %v3115_v62, %v2656_v3  ;;  %v3116_v42 = vld [vmem:[%s4400_s3 + $0xfc] sm:$0xf]  ;;  %v2664_v34 = vld [vmem:[%s4400_s3 + $0x10c] sm:$0xf0]  ;;  %v2634_v14 = vld [vmem:[%s4400_s3 + $0xc8] sm:$0xf] }
 0x18b   :  { %1375 = vmatpush.bf16.msrb.mxu3 %v2655_v23  ;;  %v2667_v12 = vor.u32 %v3116_v42, %v2664_v34  ;;  %v3092_v33 = vld [vmem:[%s4400_s3 + $0x38] sm:$0xf0]  ;;  %v3090_v62 = vld [vmem:[%s4400_s3 + $0x2c] sm:$0xf]  ;;  %v2556_v3 = vld [vmem:[%s4400_s3 + $0x3c] sm:$0xf0] }
 0x18c   :  { %v1073_v8 = vunpack.c.l.b16 %v794_v7  ;;  %v2635_v7 = vor.u32 %v3112_v61, %v2634_v14  ;;  %v2555_v23 = vor.u32 %v3092_v33, %v2554_v35  ;;  %v3091_v42 = vld [vmem:[%s4400_s3 + $0x34] sm:$0xf]  ;;  %v2564_v34 = vld [vmem:[%s4400_s3 + $0x44] sm:$0xf0] }
 0x18d   :  { %v2567_v14 = vor.u32 %v3091_v42, %v2564_v34  ;;  %v3087_v61 = vld [vmem:[%s4400_s3 + $0x10] sm:$0xf0] }
 0x18e   :  { %v1077_v39 = vpack.c.b16 %v1073_v8, %v1072_v16  ;;  %965 = vmatpush.bf16.msra.mxu0 %v948_v9  ;;  %1025 = vmatpush.bf16.msra.mxu1 %v1008_v59  ;;  %v3081_v9 = vld [vmem:[%s4399_s2 + $0x30] sm:$0xff]  ;;  %v1067_v59 = vunpack.c.l.b16 %v776_v43  ;;  %v2644_v16 = vld [vmem:[%s4400_s3 + $0xe4] sm:$0xf0] }
 0x18f   :  { %v2647_v8 = vor.u32 %v3111_v57, %v2644_v16  ;;  %1376 = vmatpush.bf16.msrb.mxu3 %v2635_v7  ;;  %v2622_v43 = vld [vmem:[%s4400_s3 + $0xa8] sm:$0xf]  ;;  %v2536_v7 = vld [vmem:[%s4400_s3 + $0x14] sm:$0xf0]  ;;  %v2544_v16 = vld [vmem:[%s4400_s3 + $0x1c] sm:$0xf0] }
 0x190   :  { %1092 = vmatpush.bf16.msra.mxu2 %v1077_v39  ;;  %2489 = vmatmul.msk.bf16.gmra.mxu3 %vm838_vm1, %v2487_v54  ;;  %v3105_v39 = vld [vmem:[%s4400_s3 + $0xa4] sm:$0xf]  ;;  %v2539_v38 = vor.u32 %v3085_v13, %v2536_v7 }
 0x192   :  { %966 = vmatpush.bf16.msra.mxu0 %v3837_v50  ;;  %1026 = vmatpush.bf16.msra.mxu1 %v3839_v26  ;;  %v1066_v50 = vunpack.c.l.b16 %v773_v29  ;;  %v3083_v26 = vld [vmem:[%s4399_s2 + $0x40] sm:$0xff]  ;;  %v2623_v29 = vor.u32 %v3108_v19, %v2622_v43  ;;  %v3119_v43 = vld [vmem:[%s4400_s3 + $0x110] sm:$0xf0] }
 0x193   :  { %1377 = vmatpush.bf16.msrb.mxu3 %v2615_v63 }
 0x194   :  { %1093 = vmatpush.bf16.msra.mxu2 %v1076_v20  ;;  %v1074_v41 = vpack.c.b16 %v1067_v59, %v1066_v50  ;;  %v2619_v20 = vor.u32 %v3105_v39, %v2616_v56  ;;  %v3102_v50 = vld [vmem:[%s4400_s3 + $0x88] sm:$0xf0]  ;;  %v2691_v39 = vor.u32 %v3124_v0, %v2690_v48  ;;  %v2670_v56 = vld [vmem:[%s4400_s3 + $0x100] sm:$0xf] }
 0x195   :  { %v2671_v19 = vor.u32 %v3119_v43, %v2670_v56 }
 0x196   :  { %967 = vmatpush.bf16.msra.mxu0 %v3816_v47  ;;  %1027 = vmatpush.bf16.msra.mxu1 %v3818_v37  ;;  %v2500_v47 = vld [vmem:[%s4399_s2 + $0x28] sm:$0xf]  ;;  %v3080_v37 = vld [vmem:[%s4399_s2 + $0x28] sm:$0x30] }
 0x197   :  { %v2501_v17 = vor.u32 %v3080_v37, %v2500_v47  ;;  %v2596_v47 = vld [vmem:[%s4400_s3 + $0x8c] sm:$0xf0]  ;;  %v2602_v37 = vld [vmem:[%s4400_s3 + $0x80] sm:$0xf] }
 0x198   :  { %1094 = vmatpush.bf16.msra.mxu2 %v1075_v40  ;;  %v2594_v40 = vld [vmem:[%s4400_s3 + $0x78] sm:$0xf] }
 0x199   :  { %2502 = vmatmul.msk.bf16.vlgmr.msra.gmra.mxu0 %vm838_vm1, %v3079_v6  ;;  %2516 = vmatmul.msk.bf16.vlgmr.msra.gmra.mxu1 %vm838_vm1, %v3081_v9  ;;  %v2624_v6 = vld [vmem:[%s4400_s3 + $0xbc] sm:$0xf0] }
 0x19a   :  { %1393 = vmatpush.bf16.msrb.mxu0 %v2679_v58  ;;  %1412 = vmatpush.bf16.msrb.mxu1 %v2683_v51  ;;  %v2627_v9 = vor.u32 %v3106_v55, %v2624_v6  ;;  %v2583_v58 = vor.u32 %v3098_v46, %v2582_v32  ;;  %v3096_v51 = vld [vmem:[%s4400_s3 + $0x5c] sm:$0xf]  ;;  %v2650_v55 = vld [vmem:[%s4400_s3 + $0xd8] sm:$0xf]  ;;  %v3114_v6 = vld [vmem:[%s4400_s3 + $0xe8] sm:$0xf0] }
 0x19b   :  { %v2587_v36 = vor.u32 %v3096_v51, %v2584_v1  ;;  %v4171_v46 = vld [vmem:[%s4403_s6] sm:$0xff]  ;;  %v2550_v1 = vld [vmem:[%s4400_s3 + $0x10] sm:$0xf] }
 0x19c   :  { %1095 = vmatpush.bf16.msra.mxu2 %v1074_v41  ;;  %v3100_v41 = vld [vmem:[%s4400_s3 + $0x7c] sm:$0xf]  ;;  %v1111_v33 = vperm.slane %v4171_v46, 0 }
 0x19d   :  { %v2599_v2 = vor.u32 %v3100_v41, %v2596_v47  ;;  %v3109_v41 = vld [vmem:[%s4400_s3 + $0xc0] sm:$0xf0] }
 0x19e   :  { %1394 = vmatpush.bf16.msrb.mxu0 %v2659_v4  ;;  %1413 = vmatpush.bf16.msrb.mxu1 %v2663_v45  ;;  %v2559_v4 = vor.u32 %v3090_v62, %v2556_v3  ;;  %v2563_v45 = vor.u32 %v3093_v27, %v2562_v31 }
 0x19f   :  { %2530 = vmatmul.msk.bf16.vlgmr.msra.gmra.mxu2 %vm838_vm1, %v3083_v26  ;;  %v2595_v26 = vor.u32 %v3102_v50, %v2594_v40  ;;  %v2630_v50 = vld [vmem:[%s4400_s3 + $0xb0] sm:$0xf] }
 0x1a0   :  { %1431 = vmatpush.bf16.msrb.mxu2 %v2687_v28 }
 0x1a1   :  { %1378 = vmatpush.bf16.msrb.mxu3 %v2595_v26  ;;  %v2631_v26 = vor.u32 %v3109_v41, %v2630_v50 }
 0x1a2   :  { %1395 = vmatpush.bf16.msrb.mxu0 %v2639_v18  ;;  %1414 = vmatpush.bf16.msrb.mxu1 %v2643_v49  ;;  %v2542_v18 = vld [vmem:[%s4400_s3 + $0x8] sm:$0xf]  ;;  %v3086_v49 = vld [vmem:[%s4400_s3 + $0xc] sm:$0xf] }
 0x1a3   :  { %v2543_v57 = vor.u32 %v3088_v30, %v2542_v18 }
 0x1a4   :  { %1432 = vmatpush.bf16.msrb.mxu2 %v2667_v12  ;;  %v2534_v12 = vld [vmem:[%s4400_s3] sm:$0xf] }
 0x1a5   :  { %v2535_v22 = vor.u32 %v3087_v61, %v2534_v12 }
 0x1a6   :  { %1396 = vmatpush.bf16.msrb.mxu0 %v2619_v20  ;;  %1415 = vmatpush.bf16.msrb.mxu1 %v2623_v29 }
 0x1a8   :  { %1433 = vmatpush.bf16.msrb.mxu2 %v2647_v8  ;;  %v2547_v8 = vor.u32 %v3086_v49, %v2544_v16 }
 0x1a9   :  { %2503 = vmatmul.msk.bf16.gmra.mxu0 %vm838_vm1, %v2501_v17  ;;  %2517 = vmatmul.msk.bf16.gmra.mxu1 %vm838_vm1, %v2515_v15  ;;  %v2603_v17 = vor.u32 %v3103_v44, %v2602_v37  ;;  %v3101_v15 = vld [vmem:[%s4400_s3 + $0x84] sm:$0xf]  ;;  %v2610_v37 = vld [vmem:[%s4400_s3 + $0x88] sm:$0xf]  ;;  %v3104_v44 = vld [vmem:[%s4400_s3 + $0x98] sm:$0xf0] }
 0x1aa   :  { %v2607_v5 = vor.u32 %v3101_v15, %v2604_v24  ;;  %1397 = vmatpush.bf16.msrb.mxu0 %v2599_v2 }
 0x1ab   :  { %1416 = vmatpush.bf16.msrb.mxu1 %v2603_v17  ;;  %v2611_v17 = vor.u32 %v3104_v44, %v2610_v37 }
 0x1ac   :  { %1434 = vmatpush.bf16.msrb.mxu2 %v2627_v9  ;;  %v2651_v9 = vor.u32 %v3114_v6, %v2650_v55 }
 0x1ae   :  { %1398 = vmatpush.bf16.msrb.mxu0 %v2579_v10 }
 0x1af   :  { %2531 = vmatmul.msk.bf16.gmra.mxu2 %vm838_vm1, %v2529_v52  ;;  %v2574_v52 = vld [vmem:[%s4400_s3 + $0x50] sm:$0xf]  ;;  %1417 = vmatpush.bf16.msrb.mxu1 %v2583_v58 }
 0x1b0   :  { %1435 = vmatpush.bf16.msrb.mxu2 %v2607_v5  ;;  %v2575_v21 = vor.u32 %v3097_v53, %v2574_v52  ;;  %v2590_v5 = vld [vmem:[%s4400_s3 + $0x60] sm:$0xf]  ;;  %v3099_v52 = vld [vmem:[%s4400_s3 + $0x70] sm:$0xf0] }
 0x1b2   :  { %1379 = vmatpush.bf16.msrb.mxu3 %v2575_v21  ;;  %1399 = vmatpush.bf16.msrb.mxu0 %v2559_v4  ;;  %v2591_v21 = vor.u32 %v3099_v52, %v2590_v5 }
 0x1b3   :  { %1418 = vmatpush.bf16.msrb.mxu1 %v2563_v45 }
 0x1b4   :  { %1436 = vmatpush.bf16.msrb.mxu2 %v2587_v36  ;;  %v3089_v36 = vld [vmem:[%s4400_s3 + $0x20] sm:$0xf0] }
 0x1b5   :  { %v2551_v31 = vor.u32 %v3089_v36, %v2550_v1 }
 0x1b6   :  { %1380 = vmatpush.bf16.msrb.mxu3 %v2555_v23  ;;  %1400 = vmatpush.bf16.msrb.mxu0 %v2539_v38 }
 0x1b7   :  { %1419 = vmatpush.bf16.msrb.mxu1 %v2543_v57 }
 0x1b8   :  { %1437 = vmatpush.bf16.msrb.mxu2 %v2567_v14 }
 0x1ba   :  { %1381 = vmatpush.bf16.msrb.mxu3 %v2535_v22 }
 0x1bc   :  { %1438 = vmatpush.bf16.msrb.mxu2 %v2547_v8 }
 0x1be   :  { %1450 = vmatpush.bf16.msra.mxu3 %v2691_v39 }
 0x1c2   :  { %1451 = vmatpush.bf16.msra.mxu3 %v2671_v19 }
 0x1c6   :  { %1452 = vmatpush.bf16.msra.mxu3 %v2651_v9 }
 0x1ca   :  { %1453 = vmatpush.bf16.msra.mxu3 %v2631_v26 }
 0x1ce   :  { %1454 = vmatpush.bf16.msra.mxu3 %v2611_v17 }
 0x1d2   :  { %1455 = vmatpush.bf16.msra.mxu3 %v2591_v21 }
 0x1e3   :  { %v3996_v54 = vpop.f32.mrf.mxu3 }
 0x1eb   :  { %v3998_v11 = vpop.f32.mrf.mxu3 }
 0x1f3   :  { %v4024_v59 = vpop.f32.mrf.mxu3 }
 0x1fb   :  { %v4074_v28 = vpop.f32.mrf.mxu3 }
 0x203   :  { %v905_v63 = vpop.f32.mrf.mxu3 }
 0x204   :  { %v906_v2 = vadd.f32 %v905_v63, %v3996_v54  ;;  %v2570_v54 = vld [vmem:[%s4400_s3 + $0x38] sm:$0xf] }
 0x20b   :  { %v907_v40 = vpop.f32.mrf.mxu3 }
 0x20c   :  { %v908_v25 = vadd.f32 %v907_v40, %v3998_v11  ;;  %v2571_v11 = vor.u32 %v3094_v60, %v2570_v54 }
 0x20e   :  { %1456 = vmatpush.bf16.msra.mxu3 %v2571_v11 }
 0x212   :  { %1457 = vmatpush.bf16.msra.mxu3 %v2551_v31  ;;  %v2696_v31 = vld [vmem:[%s4401_s4 + $0x8] sm:$0xf] }
 0x213   :  { %v910_v10 = vpop.f32.mrf.mxu3 }
 0x214   :  { %v911_v14 = vadd.f32 %v910_v10, %v4024_v59 }
 0x216   :  { %v969_v20 = vpop.f32.mrf.mxu0  ;;  %v1029_v29 = vpop.f32.mrf.mxu1 }
 0x217   :  { %v979_v53 = vadd.f32 %v969_v20, %v906_v2 }
 0x219   :  { %v1039_v58 = vadd.f32 %v1029_v29, %v979_v53 }
 0x21b   :  { %v912_v34 = vpop.f32.mrf.mxu3 }
 0x21c   :  { %v913_v22 = vadd.f32 %v912_v34, %v4074_v28 }
 0x21e   :  { %v971_v47 = vpop.f32.mrf.mxu0  ;;  %v1031_v24 = vpop.f32.mrf.mxu1 }
 0x21f   :  { %v980_v32 = vadd.f32 %v971_v47, %v908_v25 }
 0x221   :  { %v1040_v62 = vadd.f32 %v1031_v24, %v980_v32 }
 0x222   :  { %v1097_v15 = vpop.f32.mrf.mxu2 }
 0x223   :  { %v1107_v35 = vadd.f32 %v1097_v15, %v1039_v58 }
 0x225   :  { %v1112_v4 = vadd.f32 %v1111_v33, %v1107_v35 }
 0x226   :  { %v974_v51 = vpop.f32.mrf.mxu0  ;;  %v1034_v27 = vpop.f32.mrf.mxu1 }
 0x227   :  { %v981_v13 = vadd.f32 %v974_v51, %v911_v14 }
 0x229   :  { %v1041_v30 = vadd.f32 %v1034_v27, %v981_v13  ;;  %v3126_v27 = vld [vmem:[%s4401_s4 + $0x8] sm:$0x10]  ;;  %v3125_v13 = vld [vmem:[%s4401_s4] sm:$0x10] }
 0x22a   :  { %v1099_v23 = vpop.f32.mrf.mxu2 }
 0x22b   :  { %v1108_v3 = vadd.f32 %v1099_v23, %v1040_v62 }
 0x22d   :  { %v1113_v45 = vadd.f32 %v1111_v33, %v1108_v3 }
 0x22e   :  { %v976_v61 = vpop.f32.mrf.mxu0  ;;  %v1036_v18 = vpop.f32.mrf.mxu1 }
 0x22f   :  { %v1116_v42 = vpack.c.bf16 %v1113_v45, %v1112_v4  ;;  %v982_v7 = vadd.f32 %v976_v61, %v913_v22  ;;  %v2708_v4 = vld [vmem:[%s4401_s4 + $0x10] sm:$0xf]  ;;  %v2701_v61 = vld [vmem:[%s4401_s4] sm:$0xf] }
 0x231   :  { %1382 = vmatmul.bf16.vlgmr.msrb.gmra.mxu3 %v1116_v42  ;;  %1401 = vmatmul.bf16.vlgmr.msrb.gmra.mxu0 %v1116_v42  ;;  %v1042_v57 = vadd.f32 %v1036_v18, %v982_v7  ;;  %v3127_v18 = vld [vmem:[%s4401_s4 + $0x10] sm:$0x10] }
 0x232   :  { %1420 = vmatmul.bf16.vlgmr.msrb.gmra.mxu1 %v1116_v42  ;;  %1439 = vmatmul.bf16.vlgmr.msrb.gmra.mxu2 %v1116_v42  ;;  %v1102_v12 = vpop.f32.mrf.mxu2 }
 0x233   :  { %v1109_v38 = vadd.f32 %v1102_v12, %v1041_v30  ;;  %v2715_v30 = vld [vmem:[%s4401_s4 + $0x18] sm:$0xf] }
 0x235   :  { %v1114_v8 = vadd.f32 %v1111_v33, %v1109_v38  ;;  %v3128_v38 = vld [vmem:[%s4401_s4 + $0x18] sm:$0x10] }
 0x23a   :  { %v1104_v49 = vpop.f32.mrf.mxu2 }
 0x23b   :  { %v1110_v16 = vadd.f32 %v1104_v49, %v1042_v57 }
 0x23d   :  { %v1115_v48 = vadd.f32 %v1111_v33, %v1110_v16 }
 0x23f   :  { %v1117_v0 = vpack.c.bf16 %v1115_v48, %v1114_v8  ;;  %v2697_v48 = vor.u32 %v3126_v27, %v2696_v31  ;;  %v3149_v31 = vld [vmem:[%s4402_s5 + $0x98] sm:$0xff] }
 0x240   :  { %v3157_v27 = vld [vmem:[%s4402_s5 + $0xd8] sm:$0xff] }
 0x241   :  { %1387 = vmatmul.bf16.gmra.mxu3 %v1117_v0  ;;  %1406 = vmatmul.bf16.gmra.mxu0 %v1117_v0 }
 0x242   :  { %1425 = vmatmul.bf16.gmra.mxu1 %v1117_v0  ;;  %1444 = vmatmul.bf16.gmra.mxu2 %v1117_v0 }
 0x251   :  { %1458 = vmatmul.bf16.vlgmr.msra.gmra.mxu3 %v1116_v42 }
 0x261   :  { %1463 = vmatmul.bf16.gmra.mxu3 %v1117_v0  ;;  %v2702_v0 = vor.u32 %v3125_v13, %v2701_v61  ;;  %v3147_v61 = vld [vmem:[%s4402_s5 + $0x88] sm:$0xff] }
 0x262   :  { %v3155_v13 = vld [vmem:[%s4402_s5 + $0xc8] sm:$0xff] }
 0x2ae   :  { %v1402_v59 = vpop.f32.mrf.mxu0 }
 0x2af   :  { %v1421_v39 = vpop.f32.mrf.mxu1 }
 0x2b4   :  { %v1383_v63 = vpop.f32.mrf.mxu3 }
 0x2b5   :  { %v1440_v28 = vpop.f32.mrf.mxu2  ;;  %v1469_v2 = vpack.c.bf16 %v1402_v59, %v1383_v63  ;;  %v2709_v59 = vor.u32 %v3127_v18, %v2708_v4  ;;  %v3145_v63 = vld [vmem:[%s4402_s5 + $0x78] sm:$0xff]  ;;  %v3131_v4 = vld [vmem:[%s4402_s5 + $0x8] sm:$0xff]  ;;  %v3154_v18 = vld [vmem:[%s4402_s5 + $0xc0] sm:$0xff] }
 0x2b6   :  { %v1404_v56 = vpop.f32.mrf.mxu0  ;;  %v1470_v10 = vpack.c.bf16 %v1440_v28, %v1421_v39  ;;  %v2716_v39 = vor.u32 %v3128_v38, %v2715_v30  ;;  %v3165_v30 = vld [vmem:[%s4402_s5 + $0x118] sm:$0xff] }
 0x2b7   :  { %v1423_v43 = vpop.f32.mrf.mxu1  ;;  %v1495_v45 = vunpack.c.h.b16 %v1469_v2  ;;  %v1529_v42 = vunpack.c.l.b16 %v1469_v2  ;;  %v2722_v2 = vld [vmem:[%s4401_s4 + $0x20] sm:$0xf] }
 0x2b8   :  { %v1568_v22 = vunpack.c.l.b16 %v1470_v10  ;;  %v1605_v7 = vunpack.c.h.b16 %v1470_v10  ;;  %v3161_v10 = vld [vmem:[%s4402_s5 + $0xf8] sm:$0xff] }
 0x2bc   :  { %v1385_v19 = vpop.f32.mrf.mxu3 }
 0x2bd   :  { %v1442_v20 = vpop.f32.mrf.mxu2  ;;  %v1472_v17 = vpack.c.bf16 %v1404_v56, %v1385_v19  ;;  %v3144_v56 = vld [vmem:[%s4402_s5 + $0x70] sm:$0xff] }
 0x2be   :  { %v1407_v29 = vpop.f32.mrf.mxu0  ;;  %v1473_v15 = vpack.c.bf16 %v1442_v20, %v1423_v43  ;;  %v3143_v43 = vld [vmem:[%s4402_s5 + $0x68] sm:$0xff]  ;;  %v3142_v20 = vld [vmem:[%s4402_s5 + $0x60] sm:$0xff] }
 0x2bf   :  { %v1426_v55 = vpop.f32.mrf.mxu1  ;;  %v1496_v51 = vunpack.c.h.b16 %v1472_v17  ;;  %v1530_v1 = vunpack.c.l.b16 %v1472_v17  ;;  %v3129_v17 = vld [vmem:[%s4401_s4 + $0x20] sm:$0x10] }
 0x2c0   :  { %v1569_v33 = vunpack.c.l.b16 %v1473_v15  ;;  %v1606_v62 = vunpack.c.h.b16 %v1473_v15 }
 0x2c1   :  { %v1499_v57 = vpack.c.b16 %v1496_v51, %v1495_v45  ;;  %v1533_v49 = vpack.c.b16 %v1530_v1, %v1529_v42  ;;  %v3134_v51 = vld [vmem:[%s4402_s5 + $0x20] sm:$0xff]  ;;  %v3169_v1 = vld [vmem:[%s4402_s5 + $0x138] sm:$0xff]  ;;  %v3168_v45 = vld [vmem:[%s4402_s5 + $0x130] sm:$0xff] }
 0x2c2   :  { %v1572_v16 = vpack.c.b16 %v1569_v33, %v1568_v22  ;;  %v1609_v8 = vpack.c.b16 %v1606_v62, %v1605_v7  ;;  %v3133_v33 = vld [vmem:[%s4402_s5 + $0x18] sm:$0xff]  ;;  %v3150_v62 = vld [vmem:[%s4402_s5 + $0xa0] sm:$0xff]  ;;  %v3148_v42 = vld [vmem:[%s4402_s5 + $0x90] sm:$0xff] }
 0x2c3   :  { %v3166_v22 = vld [vmem:[%s4402_s5 + $0x120] sm:$0xff] }
 0x2c4   :  { %v1388_v6 = vpop.f32.mrf.mxu3  ;;  %v3146_v7 = vld [vmem:[%s4402_s5 + $0x80] sm:$0xff] }
 0x2c5   :  { %v1445_v9 = vpop.f32.mrf.mxu2  ;;  %v1475_v40 = vpack.c.bf16 %v1407_v29, %v1388_v6 }
 0x2c6   :  { %v1476_v50 = vpack.c.bf16 %v1445_v9, %v1426_v55  ;;  %v1409_v41 = vpop.f32.mrf.mxu0 }
 0x2c7   :  { %v1428_v47 = vpop.f32.mrf.mxu1  ;;  %v1497_v5 = vunpack.c.h.b16 %v1475_v40  ;;  %v1531_v52 = vunpack.c.l.b16 %v1475_v40 }
 0x2c8   :  { %v1570_v21 = vunpack.c.l.b16 %v1476_v50  ;;  %v1607_v54 = vunpack.c.h.b16 %v1476_v50 }
 0x2cc   :  { %v1390_v26 = vpop.f32.mrf.mxu3 }
 0x2cd   :  { %v1478_v37 = vpack.c.bf16 %v1409_v41, %v1390_v26  ;;  %v1447_v44 = vpop.f32.mrf.mxu2 }
 0x2ce   :  { %v1479_v24 = vpack.c.bf16 %v1447_v44, %v1428_v47 }
 0x2cf   :  { %v1498_v53 = vunpack.c.h.b16 %v1478_v37  ;;  %v1532_v25 = vunpack.c.l.b16 %v1478_v37 }
 0x2d0   :  { %v1571_v60 = vunpack.c.l.b16 %v1479_v24  ;;  %v1608_v32 = vunpack.c.h.b16 %v1479_v24  ;;  %v2723_v24 = vor.u32 %v3129_v17, %v2722_v2 }
 0x2d1   :  { %v1500_v58 = vpack.c.b16 %v1498_v53, %v1497_v5  ;;  %v1534_v11 = vpack.c.b16 %v1532_v25, %v1531_v52  ;;  %v3141_v5 = vld [vmem:[%s4402_s5 + $0x58] sm:$0xff]  ;;  %v3140_v25 = vld [vmem:[%s4402_s5 + $0x50] sm:$0xff] }
 0x2d2   :  { %v1573_v36 = vpack.c.b16 %v1571_v60, %v1570_v21  ;;  %v1610_v35 = vpack.c.b16 %v1608_v32, %v1607_v54  ;;  %v3137_v52 = vld [vmem:[%s4402_s5 + $0x38] sm:$0xff]  ;;  %v3136_v21 = vld [vmem:[%s4402_s5 + $0x30] sm:$0xff]  ;;  %v3139_v60 = vld [vmem:[%s4402_s5 + $0x48] sm:$0xff] }
 0x2d3   :  { %v1508_v23 = vsel %vm1506_vm2, %v1500_v58, 0  ;;  %v1540_v3 = vsel %vm1506_vm2, %v1534_v11, 0  ;;  %v3153_v53 = vld [vmem:[%s4402_s5 + $0xb8] sm:$0xff]  ;;  %v3152_v54 = vld [vmem:[%s4402_s5 + $0xb0] sm:$0xff]  ;;  %v3135_v32 = vld [vmem:[%s4402_s5 + $0x28] sm:$0xff] }
 0x2d4   :  { %v1459_v34 = vpop.f32.mrf.mxu3  ;;  %1516 = vmatpush.bf16.msra.mxu0 %v1508_v23  ;;  %1548 = vmatpush.bf16.msra.mxu1 %v1540_v3  ;;  %v1579_v14 = vsel %vm1506_vm2, %v1573_v36, 0  ;;  %v1616_v12 = vsel %vm1506_vm2, %v1610_v35, 0  ;;  %v3151_v58 = vld [vmem:[%s4402_s5 + $0xa8] sm:$0xff]  ;;  %v3138_v11 = vld [vmem:[%s4402_s5 + $0x40] sm:$0xff]  ;;  %v3160_v36 = vld [vmem:[%s4402_s5 + $0xf0] sm:$0xff] }
 0x2d5   :  { %1587 = vmatpush.bf16.msra.mxu2 %v1579_v14  ;;  %1624 = vmatpush.bf16.msrb.mxu3 %v1616_v12  ;;  %v1471_v41 = vpack.c.bf16 %v1459_v34, %v1459_v34  ;;  %v3159_v35 = vld [vmem:[%s4402_s5 + $0xe8] sm:$0xff]  ;;  %v3158_v23 = vld [vmem:[%s4402_s5 + $0xe0] sm:$0xff]  ;;  %v3132_v3 = vld [vmem:[%s4402_s5 + $0x10] sm:$0xff] }
 0x2d6   :  { %v3156_v34 = vld [vmem:[%s4402_s5 + $0xd0] sm:$0xff]  ;;  %v3130_v14 = vld [vmem:[%s4402_s5] sm:$0xff]  ;;  %v3167_v12 = vld [vmem:[%s4402_s5 + $0x128] sm:$0xff] }
 0x2d7   :  { %v1646_v44 = vunpack.c.l.b16 %v1471_v41 }
 0x2d8   :  { %1517 = vmatpush.bf16.msra.mxu0 %v1499_v57  ;;  %1549 = vmatpush.bf16.msra.mxu1 %v1533_v49  ;;  %v3164_v57 = vld [vmem:[%s4402_s5 + $0x110] sm:$0xff]  ;;  %v3163_v49 = vld [vmem:[%s4402_s5 + $0x108] sm:$0xff] }
 0x2d9   :  { %1588 = vmatpush.bf16.msra.mxu2 %v1572_v16  ;;  %1625 = vmatpush.bf16.msrb.mxu3 %v1609_v8 }
 0x2db   :  { %2698 = vmatmul.msk.bf16.vlgmr.msra.gmra.mxu0 %vm1502_vm3, %v2697_v48  ;;  %2703 = vmatmul.msk.bf16.vlgmr.msra.gmra.mxu1 %vm1502_vm3, %v2702_v0  ;;  %v3162_v48 = vld [vmem:[%s4402_s5 + $0x100] sm:$0xff] }
 0x2dc   :  { %v1461_v28 = vpop.f32.mrf.mxu3  ;;  %2710 = vmatmul.msk.bf16.vlgmr.msra.gmra.mxu2 %vm1502_vm3, %v2709_v59  ;;  %2717 = vmatmul.msk.bf16.vlgmr.msrb.gmra.mxu3 %vm1502_vm3, %v2716_v39 }
 0x2dd   :  { %1766 = vmatpush.bf16.msrb.mxu1 %v3145_v63  ;;  %v1474_v9 = vpack.c.bf16 %v1461_v28, %v1461_v28  ;;  %1827 = vmatpush.bf16.msrb.mxu2 %v3137_v52  ;;  %v3177_v63 = vld [vmem:[%s4402_s5 + $0x178] sm:$0xff] }
 0x2de   :  { %1907 = vmatpush.bf16.msra.mxu3 %v3153_v53 }
 0x2df   :  { %v1647_v47 = vunpack.c.l.b16 %v1474_v9 }
 0x2e1   :  { %1767 = vmatpush.bf16.msrb.mxu1 %v3144_v56  ;;  %v1650_v15 = vpack.c.b16 %v1647_v47, %v1646_v44  ;;  %1828 = vmatpush.bf16.msrb.mxu2 %v3136_v21  ;;  %v3174_v21 = vld [vmem:[%s4402_s5 + $0x160] sm:$0xff] }
 0x2e2   :  { %1908 = vmatpush.bf16.msra.mxu3 %v3152_v54  ;;  %v3173_v54 = vld [vmem:[%s4402_s5 + $0x158] sm:$0xff] }
 0x2e4   :  { %v1464_v19 = vpop.f32.mrf.mxu3 }
 0x2e5   :  { %1768 = vmatpush.bf16.msrb.mxu1 %v3143_v43  ;;  %v1477_v29 = vpack.c.bf16 %v1464_v19, %v1464_v19  ;;  %1829 = vmatpush.bf16.msrb.mxu2 %v3135_v32  ;;  %v1675_v43 = vperm.slane %v4171_v46, 1  ;;  %v3176_v19 = vld [vmem:[%s4402_s5 + $0x170] sm:$0xff]  ;;  %v3171_v32 = vld [vmem:[%s4402_s5 + $0x148] sm:$0xff] }
 0x2e6   :  { %1909 = vmatpush.bf16.msra.mxu3 %v3151_v58  ;;  %v3185_v58 = vld [vmem:[%s4402_s5 + $0x1b8] sm:$0xff] }
 0x2e7   :  { %v1648_v40 = vunpack.c.l.b16 %v1477_v29 }
 0x2e9   :  { %1769 = vmatpush.bf16.msrb.mxu1 %v3142_v20  ;;  %1830 = vmatpush.bf16.msrb.mxu2 %v3134_v51  ;;  %v3183_v51 = vld [vmem:[%s4402_s5 + $0x1a8] sm:$0xff] }
 0x2ea   :  { %1910 = vmatpush.bf16.msra.mxu3 %v3150_v62 }
 0x2ec   :  { %v1466_v55 = vpop.f32.mrf.mxu3 }
 0x2ed   :  { %v1480_v6 = vpack.c.bf16 %v1466_v55, %v1466_v55  ;;  %1770 = vmatpush.bf16.msrb.mxu1 %v3141_v5  ;;  %1831 = vmatpush.bf16.msrb.mxu2 %v3133_v33  ;;  %v3182_v33 = vld [vmem:[%s4402_s5 + $0x1a0] sm:$0xff] }
 0x2ee   :  { %1911 = vmatpush.bf16.msra.mxu3 %v3149_v31 }
 0x2ef   :  { %v1649_v50 = vunpack.c.l.b16 %v1480_v6 }
 0x2f1   :  { %v1651_v26 = vpack.c.b16 %v1649_v50, %v1648_v40  ;;  %1771 = vmatpush.bf16.msrb.mxu1 %v3140_v25  ;;  %1832 = vmatpush.bf16.msrb.mxu2 %v3132_v3  ;;  %v3175_v25 = vld [vmem:[%s4402_s5 + $0x168] sm:$0xff] }
 0x2f2   :  { %1912 = vmatpush.bf16.msra.mxu3 %v3148_v42  ;;  %v3180_v42 = vld [vmem:[%s4402_s5 + $0x190] sm:$0xff] }
 0x2f3   :  { %v1657_v37 = vsel %vm1506_vm2, %v1651_v26, 0 }
 0x2f4   :  { %1665 = vmatpush.bf16.msrb.mxu0 %v1657_v37 }
 0x2f5   :  { %1772 = vmatpush.bf16.msrb.mxu1 %v3139_v60  ;;  %1833 = vmatpush.bf16.msrb.mxu2 %v3131_v4  ;;  %v3172_v60 = vld [vmem:[%s4402_s5 + $0x150] sm:$0xff] }
 0x2f6   :  { %1913 = vmatpush.bf16.msra.mxu3 %v3147_v61 }
 0x2f8   :  { %1666 = vmatpush.bf16.msrb.mxu0 %v1650_v15 }
 0x2f9   :  { %1773 = vmatpush.bf16.msrb.mxu1 %v3138_v11  ;;  %1834 = vmatpush.bf16.msrb.mxu2 %v3130_v14  ;;  %v3184_v11 = vld [vmem:[%s4402_s5 + $0x1b0] sm:$0xff] }
 0x2fa   :  { %1914 = vmatpush.bf16.msra.mxu3 %v3146_v7 }
 0x2fb   :  { %2724 = vmatmul.msk.bf16.vlgmr.msrb.gmra.mxu0 %vm1502_vm3, %v2723_v24 }
 0x2fc   :  { %1988 = vmatpush.bf16.msra.mxu0 %v3161_v10  ;;  %v3170_v10 = vld [vmem:[%s4402_s5 + $0x140] sm:$0xff] }
 0x2fd   :  { %2067 = vmatpush.bf16.msra.mxu1 %v3169_v1  ;;  %2151 = vmatpush.bf16.msra.mxu2 %v3177_v63 }
 0x2fe   :  { %2232 = vmatpush.bf16.msrb.mxu3 %v3185_v58 }
 0x300   :  { %1989 = vmatpush.bf16.msra.mxu0 %v3160_v36 }
 0x301   :  { %2068 = vmatpush.bf16.msra.mxu1 %v3168_v45  ;;  %2152 = vmatpush.bf16.msra.mxu2 %v3176_v19 }
 0x302   :  { %2233 = vmatpush.bf16.msrb.mxu3 %v3184_v11 }
 0x304   :  { %1990 = vmatpush.bf16.msra.mxu0 %v3159_v35 }
 0x305   :  { %2069 = vmatpush.bf16.msra.mxu1 %v3167_v12  ;;  %2153 = vmatpush.bf16.msra.mxu2 %v3175_v25  ;;  %v2081_v12 = vperm.slane %v4171_v46, 2 }
 0x306   :  { %2234 = vmatpush.bf16.msrb.mxu3 %v3183_v51 }
 0x308   :  { %1991 = vmatpush.bf16.msra.mxu0 %v3158_v23  ;;  %v3181_v23 = vld [vmem:[%s4402_s5 + $0x198] sm:$0xff] }
 0x309   :  { %2070 = vmatpush.bf16.msra.mxu1 %v3166_v22  ;;  %2154 = vmatpush.bf16.msra.mxu2 %v3174_v21 }
 0x30a   :  { %2235 = vmatpush.bf16.msrb.mxu3 %v3182_v33 }
 0x30c   :  { %1992 = vmatpush.bf16.msra.mxu0 %v3157_v27 }
 0x30d   :  { %2071 = vmatpush.bf16.msra.mxu1 %v3165_v30  ;;  %2155 = vmatpush.bf16.msra.mxu2 %v3173_v54 }
 0x30e   :  { %2236 = vmatpush.bf16.msrb.mxu3 %v3181_v23 }
 0x310   :  { %1993 = vmatpush.bf16.msra.mxu0 %v3156_v34 }
 0x311   :  { %2072 = vmatpush.bf16.msra.mxu1 %v3164_v57  ;;  %2156 = vmatpush.bf16.msra.mxu2 %v3172_v60  ;;  %v3178_v57 = vld [vmem:[%s4402_s5 + $0x180] sm:$0xff] }
 0x312   :  { %2237 = vmatpush.bf16.msrb.mxu3 %v3180_v42 }
 0x314   :  { %1994 = vmatpush.bf16.msra.mxu0 %v3155_v13 }
 0x315   :  { %2073 = vmatpush.bf16.msra.mxu1 %v3163_v49  ;;  %2157 = vmatpush.bf16.msra.mxu2 %v3171_v32  ;;  %v2102_v49 = vperm.slane %v4171_v46, 3 }
 0x318   :  { %1995 = vmatpush.bf16.msra.mxu0 %v3154_v18 }
 0x319   :  { %2074 = vmatpush.bf16.msra.mxu1 %v3162_v48  ;;  %2158 = vmatpush.bf16.msra.mxu2 %v3170_v10 }
 0x358   :  { %v1519_v38 = vpop.f32.mrf.mxu0  ;;  %v1551_v16 = vpop.f32.mrf.mxu1 }
 0x359   :  { %v1552_v8 = vadd.f32 %v1551_v16, %v1519_v38  ;;  %v3179_v38 = vld [vmem:[%s4402_s5 + $0x188] sm:$0xff] }
 0x35a   :  { %2238 = vmatpush.bf16.msrb.mxu3 %v3179_v38 }
 0x35e   :  { %2239 = vmatpush.bf16.msrb.mxu3 %v3178_v57 }
 0x35f   :  { %v1590_v59 = vpop.f32.mrf.mxu2  ;;  %v1627_v28 = vpop.f32.mrf.mxu3 }
 0x360   :  { %v1521_v0 = vpop.f32.mrf.mxu0  ;;  %v1595_v39 = vadd.f32 %v1590_v59, %v1552_v8  ;;  %v1553_v9 = vpop.f32.mrf.mxu1 }
 0x361   :  { %v1554_v41 = vadd.f32 %v1553_v9, %v1521_v0 }
 0x362   :  { %v1632_v56 = vadd.f32 %v1627_v28, %v1595_v39  ;;  %v2183_v39 = vperm.slane %v4171_v46, 4 }
 0x367   :  { %v1592_v26 = vpop.f32.mrf.mxu2  ;;  %v1629_v17 = vpop.f32.mrf.mxu3 }
 0x368   :  { %v1596_v2 = vadd.f32 %v1592_v26, %v1554_v41 }
 0x36a   :  { %v1633_v24 = vadd.f32 %v1629_v17, %v1596_v2 }
 0x378   :  { %v1668_v20 = vpop.f32.mrf.mxu0 }
 0x379   :  { %v1673_v29 = vadd.f32 %v1668_v20, %v1632_v56 }
 0x37b   :  { %v1676_v55 = vadd.f32 %v1675_v43, %v1673_v29 }
 0x37d   :  { %v1678_v6 = vpack.c.bf16 %v1676_v55, %v1676_v55 }
 0x37f   :  { %v1714_v40 = vunpack.c.l.b16 %v1678_v6  ;;  %1835 = vmatmul.bf16.vlgmr.msrb.gmra.mxu2 %v1678_v6 }
 0x380   :  { %v1670_v15 = vpop.f32.mrf.mxu0 }
 0x381   :  { %v1715_v50 = vpack.c.b16 %v1714_v40, %v1714_v40  ;;  %v1674_v5 = vadd.f32 %v1670_v15, %v1633_v24 }
 0x383   :  { %v1716_v47 = vrot.slane %v1715_v50, 1  ;;  %v1857_v37 = vrot.slane %v1715_v50, 2  ;;  %v1938_v44 = vrot.slane %v1715_v50, 3  ;;  %v1677_v52 = vadd.f32 %v1675_v43, %v1674_v5 }
 0x385   :  { %1774 = vmatmul.bf16.vlgmr.msrb.gmra.mxu1 %v1716_v47  ;;  %1915 = vmatmul.bf16.vlgmr.msra.gmra.mxu3 %v1857_v37  ;;  %v1679_v53 = vpack.c.bf16 %v1677_v52, %v1677_v52 }
 0x386   :  { %1996 = vmatmul.bf16.vlgmr.msra.gmra.mxu0 %v1938_v44 }
 0x395   :  { %2075 = vmatmul.bf16.vlgmr.msra.gmra.mxu1 %v1679_v53 }
 0x402   :  { %v1775_v1 = vpop.f32.mrf.mxu1  ;;  %v1836_v36 = vpop.f32.mrf.mxu2 }
 0x403   :  { %v1997_v35 = vpop.f32.mrf.mxu0  ;;  %v1837_v27 = vadd.f32 %v1836_v36, %v1775_v1 }
 0x408   :  { %v1916_v62 = vpop.f32.mrf.mxu3 }
 0x409   :  { %v1920_v45 = vadd.f32 %v1916_v62, %v1837_v27 }
 0x40a   :  { %v1777_v3 = vpop.f32.mrf.mxu1  ;;  %v1838_v31 = vpop.f32.mrf.mxu2 }
 0x40b   :  { %v1999_v4 = vpop.f32.mrf.mxu0  ;;  %v2001_v14 = vadd.f32 %v1997_v35, %v1920_v45 }
 0x410   :  { %v1918_v34 = vpop.f32.mrf.mxu3 }
 0x412   :  { %v2076_v61 = vpop.f32.mrf.mxu1 }
 0x413   :  { %v2080_v13 = vadd.f32 %v2076_v61, %v2001_v14 }
 0x415   :  { %v2082_v22 = vadd.f32 %v2081_v12, %v2080_v13 }
 0x417   :  { %v2083_v7 = vmax.f32 %v2082_v22, 0.0 }
 0x419   :  { %v2084_v18 = vpack.c.bf16 %v2083_v7, %v2083_v7 }
 0x41a   :  { %v2078_v30 = vpop.f32.mrf.mxu1 }
 0x41b   :  { %2159 = vmatmul.bf16.vlgmr.msra.gmra.mxu2 %v2084_v18 }
 0x49e   :  { %v2160_v16 = vpop.f32.mrf.mxu2 }
 0x49f   :  { %v2161_v8 = vadd.f32 %v2160_v16, %v2102_v49 }
 0x4a1   :  { %v2164_v48 = vmax.f32 %v2161_v8, 0.0 }
 0x4a3   :  { %v2165_v0 = vpack.c.bf16 %v2164_v48, %v2164_v48 }
 0x4a5   :  { %2240 = vmatmul.bf16.vlgmr.msrb.gmra.mxu3 %v2165_v0 }
 0x4a6   :  { %v2162_v59 = vpop.f32.mrf.mxu2 }
 0x528   :  { %v2241_v63 = vpop.f32.mrf.mxu3 }
 0x529   :  { %v2242_v28 = vadd.f32 %v2241_v63, %v2183_v39 }
 0x52b   :  { %2245 = vst [vmem:[#allocation2] sm:$0x3] %v2242_v28 }
 0x52c   :  { %2256 = dma.vmem_to_hbm [thread:$0]  %s2252_s0, 32, %s2254_s9, [#allocation3]  }
 0x530   :  { %v2243_v56 = vpop.f32.mrf.mxu3 }
 0x531   :  { %3211 = dma.done.wait [#allocation3], 32  }
 0x532   :  { %3212 = vsyncadd [#allocation3], 4294967264 }
 0x533   :  { %2261 = vsyncpa [#allocation3], 1 }

</bundles_post_ra>
